<compile_context>
chip_gen: v5e
topology: v5e:2x2
jax: 0.10.0
libtpu: 0.0.40
codegen_flags: <defaults>
</compile_context>

<pallas_src>
import jax
import jax.numpy as jnp
from jax.experimental import pallas as pl
from jax.experimental.pallas import tpu as pltpu

NEG_SLOPE = 0.01   # nn.LeakyReLU() default
BN_EPS = 1e-5      # nn.BatchNorm1d default
HIDDEN = [300, 100, 75, 75, 75, 50, 50, 50, 50, 50, 50]   # exactly the PyTorch Sequential


def _round_up(v, m):
    return (v + m - 1) // m * m


# ---------------------------------------------------------------------------
# Parameter init (same structure as the PyTorch module) and one-time packing.
# ---------------------------------------------------------------------------
def init_params(key, noise_dim, num_features):
    dims = [noise_dim] + HIDDEN
    blocks = []
    for i in range(len(HIDDEN)):
        key, kw, kg, kb = jax.random.split(key, 4)
        fan_in, fan_out = dims[i], dims[i + 1]
        w = (jax.random.normal(kw, (fan_in, fan_out), jnp.float32)
             * (1.0 / jnp.sqrt(fan_in)))
        gamma = 1.0 + 0.05 * jax.random.normal(kg, (1, fan_out), jnp.float32)
        beta = 0.05 * jax.random.normal(kb, (1, fan_out), jnp.float32)
        blocks.append((w, gamma, beta))
    key, kw, kb = jax.random.split(key, 3)
    w_out = (jax.random.normal(kw, (HIDDEN[-1], num_features), jnp.float32)
             * (1.0 / jnp.sqrt(HIDDEN[-1])))
    b_out = 0.05 * jax.random.normal(kb, (1, num_features), jnp.float32)
    return {"blocks": blocks, "w_out": w_out, "b_out": b_out}


def pack_params(params, noise_dim, num_features):
    """Pack weights into two bf16 slabs (384-lane layer 0, 128-lane rest) plus
    two f32 gamma/beta/bias slabs."""
    blocks = params["blocks"]
    n_blocks = len(blocks)                                     # 11

    # ---- layer 0: its own 384-lane slab -------------------------------------
    w0, g0, b0 = blocks[0]
    lane0 = _round_up(w0.shape[1], 128)                        # 384
    k0 = _round_up(noise_dim, 128)                             # 128
    w0_slab = jnp.zeros((k0, lane0), jnp.float32)
    w0_slab = w0_slab.at[:w0.shape[0], :w0.shape[1]].set(w0).astype(jnp.bfloat16)
    gb0 = jnp.zeros((2, lane0), jnp.float32)
    gb0 = gb0.at[0, :g0.shape[-1]].set(g0.reshape(-1))
    gb0 = gb0.at[1, :b0.shape[-1]].set(b0.reshape(-1))

    # ---- layers 1..11 + output layer: 128-lane slab --------------------------
    lane = 128
    ws = [blocks[i][0] for i in range(1, n_blocks)] + [params["w_out"]]
    k_pads = tuple(_round_up(w.shape[0], 128) for w in ws)     # (384, 128, ..., 128)
    offsets, off = [], 0
    for kp in k_pads:
        offsets.append(off)
        off += kp
    wr_slab = jnp.zeros((off, lane), jnp.float32)
    for i, w in enumerate(ws):
        wr_slab = wr_slab.at[offsets[i]:offsets[i] + w.shape[0], :w.shape[1]].set(w)
    wr_slab = wr_slab.astype(jnp.bfloat16)                     # bf16 MXU inputs

    n_rest_bn = n_blocks - 1                                   # 10 BN layers in this slab
    aux = jnp.zeros((2 * n_rest_bn + 1, lane), jnp.float32)
    for j in range(n_rest_bn):
        _, g, b = blocks[j + 1]
        aux = aux.at[2 * j, :g.shape[-1]].set(g.reshape(-1))
        aux = aux.at[2 * j + 1, :b.shape[-1]].set(b.reshape(-1))
    aux = aux.at[2 * n_rest_bn, :params["b_out"].shape[-1]].set(params["b_out"].reshape(-1))

    dims = [noise_dim] + HIDDEN + [num_features]
    layout = {
        "k0": k0, "lane0": lane0, "lane": lane,
        "offsets": tuple(offsets), "k_pads": k_pads,
        "n_rest_bn": n_rest_bn,
        "true_shapes": tuple((dims[i], dims[i + 1]) for i in range(len(dims) - 1)),
    }
    return w0_slab, gb0, wr_slab, aux, layout


# ---------------------------------------------------------------------------
# Kernel.
# ---------------------------------------------------------------------------
def _make_kernel(layout, batch):
    offsets = layout["offsets"]
    k_pads = layout["k_pads"]
    n_rest_bn = layout["n_rest_bn"]
    inv_b = 1.0 / float(batch)

    def batchnorm(z, gb):
        # Two-pass (numerically safe) training-mode BN over the batch axis.
        mean = jnp.sum(z, axis=0, keepdims=True) * inv_b       # (1, lane)
        c = z - mean
        var = jnp.sum(c * c, axis=0, keepdims=True) * inv_b    # biased variance
        scale = gb[0:1, :] * jax.lax.rsqrt(var + BN_EPS)       # gamma folded in
        return c * scale + gb[1:2, :]

    def kernel(x_ref, w0_ref, gb0_ref, wr_ref, aux_ref, out_ref):
        # ---- layer 0: Linear(noise, 300, bias=False) + LeakyReLU + BN (384 lanes)
        x = x_ref[...]                                          # (B, 128) f32
        z = jnp.dot(x.astype(jnp.bfloat16), w0_ref[...],
                    preferred_element_type=jnp.float32)         # (B, 384) f32
        z = jnp.maximum(z, NEG_SLOPE * z)                       # LeakyReLU (single max)
        h = batchnorm(z, gb0_ref[...])                          # (B, 384) f32

        # ---- layers 1..10: Linear + LeakyReLU + BN (128 lanes) -----------------
        for j in range(n_rest_bn):
            off, kp = offsets[j], k_pads[j]
            w = wr_ref[off:off + kp, :]                         # (kp, 128) bf16, static
            hk = h if h.shape[1] == kp else h[:, :kp]
            z = jnp.dot(hk.astype(jnp.bfloat16), w,
                        preferred_element_type=jnp.float32)     # (B, 128) f32
            z = jnp.maximum(z, NEG_SLOPE * z)
            gb = aux_ref[2 * j:2 * j + 2, :]                    # one 2-row load
            h = batchnorm(z, gb)                                # (B, 128) f32

        # ---- final Linear(50, numFeatures) with bias, lane-dense 128-wide output
        off, kp = offsets[n_rest_bn], k_pads[n_rest_bn]
        w = wr_ref[off:off + kp, :]
        hk = h if h.shape[1] == kp else h[:, :kp]
        z = jnp.dot(hk.astype(jnp.bfloat16), w, preferred_element_type=jnp.float32)
        out_ref[...] = (z + aux_ref[2 * n_rest_bn:2 * n_rest_bn + 1, :]).astype(out_ref.dtype)

    return kernel


def generator_forward(x, w0_slab, gb0, wr_slab, aux_slab, layout, num_features):
    batch = x.shape[0]
    k0, lane0, lane = layout["k0"], layout["lane0"], layout["lane"]
    # Pad the noise input to the lane-aligned first-layer K width (padded lanes hit
    # zero weight rows, so the pad value is irrelevant; use zeros anyway).
    x_pad = jnp.zeros((batch, k0), jnp.float32).at[:, :x.shape[1]].set(x)

    flops = int(2 * batch * sum(k * n for k, n in layout["true_shapes"]))
    transcendentals = int(lane0 + layout["n_rest_bn"] * lane)   # one rsqrt lane-vector per BN
    bytes_accessed = int(
        batch * k0 * 4                                          # x_pad (f32)
        + k0 * lane0 * 2 + wr_slab.shape[0] * lane * 2          # bf16 weight slabs
        + 2 * lane0 * 4 + aux_slab.shape[0] * lane * 4          # gamma/beta/bias (f32)
        + batch * lane * 4)                                     # lane-dense output

    kernel = _make_kernel(layout, batch)
    # Whole batch in one gridless call: training-mode BN needs full-batch statistics,
    # and all live data (~0.55 MiB) is far under VMEM on every generation (incl. v7x).
    out = pl.pallas_call(
        kernel,
        out_shape=jax.ShapeDtypeStruct((batch, lane), jnp.float32),   # lane-dense output
        in_specs=[pl.BlockSpec(memory_space=pltpu.MemorySpace.VMEM)] * 5,
        out_specs=pl.BlockSpec(memory_space=pltpu.MemorySpace.VMEM),
        cost_estimate=pl.CostEstimate(flops=flops,
                                      transcendentals=transcendentals,
                                      bytes_accessed=bytes_accessed),
    )(x_pad, w0_slab, gb0, wr_slab, aux_slab)
    return out[:, :num_features]


# ---------------------------------------------------------------------------
# Plain-JAX reference (mirrors the bf16 MXU-input casting; standard two-pass BN).
# A true f32 PyTorch forward would differ only by bf16 matmul rounding.
# ---------------------------------------------------------------------------
def reference_forward(x, params):
    h = x.astype(jnp.float32)
    for (w, g, b) in params["blocks"]:
        z = jnp.dot(h.astype(jnp.bfloat16), w.astype(jnp.bfloat16),
                    preferred_element_type=jnp.float32)
        z = jnp.where(z > 0, z, NEG_SLOPE * z)
        mean = jnp.mean(z, axis=0, keepdims=True)
        var = jnp.mean((z - mean) ** 2, axis=0, keepdims=True)
        h = (z - mean) / jnp.sqrt(var + BN_EPS) * g + b
    return (jnp.dot(h.astype(jnp.bfloat16), params["w_out"].astype(jnp.bfloat16),
                    preferred_element_type=jnp.float32) + params["b_out"])


if __name__ == "__main__":
    B, NOISE_DIM, NUM_FEATURES = 8, 32, 16
    key = jax.random.PRNGKey(0)
    key, kx = jax.random.split(key)
    x = jax.random.normal(kx, (B, NOISE_DIM), jnp.float32)

    params = init_params(key, NOISE_DIM, NUM_FEATURES)
    w0_slab, gb0, wr_slab, aux_slab, layout = pack_params(params, NOISE_DIM, NUM_FEATURES)

    @jax.jit
    def fwd(x, w0_slab, gb0, wr_slab, aux_slab):
        return generator_forward(x, w0_slab, gb0, wr_slab, aux_slab,
                                 layout, NUM_FEATURES)

    out = jax.block_until_ready(fwd(x, w0_slab, gb0, wr_slab, aux_slab))

    ref = reference_forward(x, params)
    assert out.shape == (B, NUM_FEATURES)
    # Kernel and reference share the bf16 MXU casting and the two-pass BN formula;
    # remaining differences are f32 rounding-order only.
    assert jnp.allclose(out, ref, atol=3e-2, rtol=3e-2)
    # TODO(synk): BatchNorm running_mean/running_var updates (PyTorch training-state
    # side effect) are not emitted; forward output parity only.
    print("KERNEL_OK")
</pallas_src>

<mosaic_0001>
module attributes {stable_mosaic.version = 11 : i64} {
  func.func @kernel(%arg0: memref<8x128xf32, #tpu.memory_space<vmem>>, %arg1: memref<128x384xbf16, #tpu.memory_space<vmem>>, %arg2: memref<2x384xf32, #tpu.memory_space<vmem>>, %arg3: memref<1664x128xbf16, #tpu.memory_space<vmem>>, %arg4: memref<21x128xf32, #tpu.memory_space<vmem>>, %arg5: memref<8x128xf32, #tpu.memory_space<vmem>>) attributes {dimension_semantics = [], scalar_prefetch = 0 : i64, scratch_operands = 0 : i64, tpu.core_type = #tpu.core_type<tc>} {
    %c0 = arith.constant 0 : index
    %c0_0 = arith.constant 0 : index
    %0 = vector.load %arg0[%c0, %c0_0] : memref<8x128xf32, #tpu.memory_space<vmem>>, vector<8x128xf32>
    %1 = arith.truncf %0 : vector<8x128xf32> to vector<8x128xbf16>
    %c0_1 = arith.constant 0 : index
    %c0_2 = arith.constant 0 : index
    %2 = vector.load %arg1[%c0_1, %c0_2] : memref<128x384xbf16, #tpu.memory_space<vmem>>, vector<128x384xbf16>
    %cst = arith.constant dense<0.000000e+00> : vector<8x384xf32>
    %3 = tpu.matmul %1, %2, %cst {dimension_numbers = #tpu.dot_dimension_numbers<[1], [0], [0], [1], [0, 0, 1, 1], [], []>} : vector<8x128xbf16>, vector<128x384xbf16>, vector<8x384xf32> -> vector<8x384xf32>
    %cst_3 = arith.constant 0.00999999977 : f32
    %4 = vector.broadcast %cst_3 : f32 to vector<8x384xf32>
    %5 = arith.mulf %4, %3 : vector<8x384xf32>
    %6 = arith.maximumf %3, %5 : vector<8x384xf32>
    %c0_4 = arith.constant 0 : index
    %c0_5 = arith.constant 0 : index
    %7 = vector.load %arg2[%c0_4, %c0_5] : memref<2x384xf32, #tpu.memory_space<vmem>>, vector<2x384xf32>
    %cst_6 = arith.constant dense<0.000000e+00> : vector<384xf32>
    %8 = vector.multi_reduction <add>, %6, %cst_6 [0] : vector<8x384xf32> to vector<384xf32>
    %9 = vector.shape_cast %8 : vector<384xf32> to vector<1x384xf32>
    %cst_7 = arith.constant 1.250000e-01 : f32
    %10 = vector.broadcast %cst_7 : f32 to vector<1x384xf32>
    %11 = arith.mulf %9, %10 : vector<1x384xf32>
    %12 = vector.broadcast %11 : vector<1x384xf32> to vector<8x384xf32>
    %13 = arith.subf %6, %12 : vector<8x384xf32>
    %14 = arith.mulf %13, %13 : vector<8x384xf32>
    %cst_8 = arith.constant dense<0.000000e+00> : vector<384xf32>
    %15 = vector.multi_reduction <add>, %14, %cst_8 [0] : vector<8x384xf32> to vector<384xf32>
    %16 = vector.shape_cast %15 : vector<384xf32> to vector<1x384xf32>
    %cst_9 = arith.constant 1.250000e-01 : f32
    %17 = vector.broadcast %cst_9 : f32 to vector<1x384xf32>
    %18 = arith.mulf %16, %17 : vector<1x384xf32>
    %19 = vector.extract_strided_slice %7 {offsets = [0, 0], sizes = [1, 384], strides = [1, 1]} : vector<2x384xf32> to vector<1x384xf32>
    %cst_10 = arith.constant 9.99999974E-6 : f32
    %20 = vector.broadcast %cst_10 : f32 to vector<1x384xf32>
    %21 = arith.addf %18, %20 : vector<1x384xf32>
    %22 = math.rsqrt %21 : vector<1x384xf32>
    %23 = arith.mulf %19, %22 : vector<1x384xf32>
    %24 = vector.broadcast %23 : vector<1x384xf32> to vector<8x384xf32>
    %25 = arith.mulf %13, %24 : vector<8x384xf32>
    %26 = vector.extract_strided_slice %7 {offsets = [1, 0], sizes = [1, 384], strides = [1, 1]} : vector<2x384xf32> to vector<1x384xf32>
    %27 = vector.broadcast %26 : vector<1x384xf32> to vector<8x384xf32>
    %28 = arith.addf %25, %27 : vector<8x384xf32>
    %c0_11 = arith.constant 0 : index
    %c0_12 = arith.constant 0 : index
    %29 = vector.load %arg3[%c0_11, %c0_12] : memref<1664x128xbf16, #tpu.memory_space<vmem>>, vector<384x128xbf16>
    %30 = arith.truncf %28 : vector<8x384xf32> to vector<8x384xbf16>
    %cst_13 = arith.constant dense<0.000000e+00> : vector<8x128xf32>
    %31 = tpu.matmul %30, %29, %cst_13 {dimension_numbers = #tpu.dot_dimension_numbers<[1], [0], [0], [1], [0, 0, 1, 1], [], []>} : vector<8x384xbf16>, vector<384x128xbf16>, vector<8x128xf32> -> vector<8x128xf32>
    %cst_14 = arith.constant 0.00999999977 : f32
    %32 = vector.broadcast %cst_14 : f32 to vector<8x128xf32>
    %33 = arith.mulf %32, %31 : vector<8x128xf32>
    %34 = arith.maximumf %31, %33 : vector<8x128xf32>
    %c0_15 = arith.constant 0 : index
    %c0_16 = arith.constant 0 : index
    %35 = vector.load %arg4[%c0_15, %c0_16] : memref<21x128xf32, #tpu.memory_space<vmem>>, vector<2x128xf32>
    %cst_17 = arith.constant dense<0.000000e+00> : vector<128xf32>
    %36 = vector.multi_reduction <add>, %34, %cst_17 [0] : vector<8x128xf32> to vector<128xf32>
    %37 = vector.shape_cast %36 : vector<128xf32> to vector<1x128xf32>
    %cst_18 = arith.constant 1.250000e-01 : f32
    %38 = vector.broadcast %cst_18 : f32 to vector<1x128xf32>
    %39 = arith.mulf %37, %38 : vector<1x128xf32>
    %40 = vector.broadcast %39 : vector<1x128xf32> to vector<8x128xf32>
    %41 = arith.subf %34, %40 : vector<8x128xf32>
    %42 = arith.mulf %41, %41 : vector<8x128xf32>
    %cst_19 = arith.constant dense<0.000000e+00> : vector<128xf32>
    %43 = vector.multi_reduction <add>, %42, %cst_19 [0] : vector<8x128xf32> to vector<128xf32>
    %44 = vector.shape_cast %43 : vector<128xf32> to vector<1x128xf32>
    %cst_20 = arith.constant 1.250000e-01 : f32
    %45 = vector.broadcast %cst_20 : f32 to vector<1x128xf32>
    %46 = arith.mulf %44, %45 : vector<1x128xf32>
    %47 = vector.extract_strided_slice %35 {offsets = [0, 0], sizes = [1, 128], strides = [1, 1]} : vector<2x128xf32> to vector<1x128xf32>
    %cst_21 = arith.constant 9.99999974E-6 : f32
    %48 = vector.broadcast %cst_21 : f32 to vector<1x128xf32>
    %49 = arith.addf %46, %48 : vector<1x128xf32>
    %50 = math.rsqrt %49 : vector<1x128xf32>
    %51 = arith.mulf %47, %50 : vector<1x128xf32>
    %52 = vector.broadcast %51 : vector<1x128xf32> to vector<8x128xf32>
    %53 = arith.mulf %41, %52 : vector<8x128xf32>
    %54 = vector.extract_strided_slice %35 {offsets = [1, 0], sizes = [1, 128], strides = [1, 1]} : vector<2x128xf32> to vector<1x128xf32>
    %55 = vector.broadcast %54 : vector<1x128xf32> to vector<8x128xf32>
    %56 = arith.addf %53, %55 : vector<8x128xf32>
    %c384 = arith.constant 384 : index
    %c0_22 = arith.constant 0 : index
    %57 = vector.load %arg3[%c384, %c0_22] : memref<1664x128xbf16, #tpu.memory_space<vmem>>, vector<128x128xbf16>
    %58 = arith.truncf %56 : vector<8x128xf32> to vector<8x128xbf16>
    %cst_23 = arith.constant dense<0.000000e+00> : vector<8x128xf32>
    %59 = tpu.matmul %58, %57, %cst_23 {dimension_numbers = #tpu.dot_dimension_numbers<[1], [0], [0], [1], [0, 0, 1, 1], [], []>} : vector<8x128xbf16>, vector<128x128xbf16>, vector<8x128xf32> -> vector<8x128xf32>
    %cst_24 = arith.constant 0.00999999977 : f32
    %60 = vector.broadcast %cst_24 : f32 to vector<8x128xf32>
    %61 = arith.mulf %60, %59 : vector<8x128xf32>
    %62 = arith.maximumf %59, %61 : vector<8x128xf32>
    %c2 = arith.constant 2 : index
    %c0_25 = arith.constant 0 : index
    %63 = vector.load %arg4[%c2, %c0_25] : memref<21x128xf32, #tpu.memory_space<vmem>>, vector<2x128xf32>
    %cst_26 = arith.constant dense<0.000000e+00> : vector<128xf32>
    %64 = vector.multi_reduction <add>, %62, %cst_26 [0] : vector<8x128xf32> to vector<128xf32>
    %65 = vector.shape_cast %64 : vector<128xf32> to vector<1x128xf32>
    %cst_27 = arith.constant 1.250000e-01 : f32
    %66 = vector.broadcast %cst_27 : f32 to vector<1x128xf32>
    %67 = arith.mulf %65, %66 : vector<1x128xf32>
    %68 = vector.broadcast %67 : vector<1x128xf32> to vector<8x128xf32>
    %69 = arith.subf %62, %68 : vector<8x128xf32>
    %70 = arith.mulf %69, %69 : vector<8x128xf32>
    %cst_28 = arith.constant dense<0.000000e+00> : vector<128xf32>
    %71 = vector.multi_reduction <add>, %70, %cst_28 [0] : vector<8x128xf32> to vector<128xf32>
    %72 = vector.shape_cast %71 : vector<128xf32> to vector<1x128xf32>
    %cst_29 = arith.constant 1.250000e-01 : f32
    %73 = vector.broadcast %cst_29 : f32 to vector<1x128xf32>
    %74 = arith.mulf %72, %73 : vector<1x128xf32>
    %75 = vector.extract_strided_slice %63 {offsets = [0, 0], sizes = [1, 128], strides = [1, 1]} : vector<2x128xf32> to vector<1x128xf32>
    %cst_30 = arith.constant 9.99999974E-6 : f32
    %76 = vector.broadcast %cst_30 : f32 to vector<1x128xf32>
    %77 = arith.addf %74, %76 : vector<1x128xf32>
    %78 = math.rsqrt %77 : vector<1x128xf32>
    %79 = arith.mulf %75, %78 : vector<1x128xf32>
    %80 = vector.broadcast %79 : vector<1x128xf32> to vector<8x128xf32>
    %81 = arith.mulf %69, %80 : vector<8x128xf32>
    %82 = vector.extract_strided_slice %63 {offsets = [1, 0], sizes = [1, 128], strides = [1, 1]} : vector<2x128xf32> to vector<1x128xf32>
    %83 = vector.broadcast %82 : vector<1x128xf32> to vector<8x128xf32>
    %84 = arith.addf %81, %83 : vector<8x128xf32>
    %c512 = arith.constant 512 : index
    %c0_31 = arith.constant 0 : index
    %85 = vector.load %arg3[%c512, %c0_31] : memref<1664x128xbf16, #tpu.memory_space<vmem>>, vector<128x128xbf16>
    %86 = arith.truncf %84 : vector<8x128xf32> to vector<8x128xbf16>
    %cst_32 = arith.constant dense<0.000000e+00> : vector<8x128xf32>
    %87 = tpu.matmul %86, %85, %cst_32 {dimension_numbers = #tpu.dot_dimension_numbers<[1], [0], [0], [1], [0, 0, 1, 1], [], []>} : vector<8x128xbf16>, vector<128x128xbf16>, vector<8x128xf32> -> vector<8x128xf32>
    %cst_33 = arith.constant 0.00999999977 : f32
    %88 = vector.broadcast %cst_33 : f32 to vector<8x128xf32>
    %89 = arith.mulf %88, %87 : vector<8x128xf32>
    %90 = arith.maximumf %87, %89 : vector<8x128xf32>
    %c4 = arith.constant 4 : index
    %c0_34 = arith.constant 0 : index
    %91 = vector.load %arg4[%c4, %c0_34] : memref<21x128xf32, #tpu.memory_space<vmem>>, vector<2x128xf32>
    %cst_35 = arith.constant dense<0.000000e+00> : vector<128xf32>
    %92 = vector.multi_reduction <add>, %90, %cst_35 [0] : vector<8x128xf32> to vector<128xf32>
    %93 = vector.shape_cast %92 : vector<128xf32> to vector<1x128xf32>
    %cst_36 = arith.constant 1.250000e-01 : f32
    %94 = vector.broadcast %cst_36 : f32 to vector<1x128xf32>
    %95 = arith.mulf %93, %94 : vector<1x128xf32>
    %96 = vector.broadcast %95 : vector<1x128xf32> to vector<8x128xf32>
    %97 = arith.subf %90, %96 : vector<8x128xf32>
    %98 = arith.mulf %97, %97 : vector<8x128xf32>
    %cst_37 = arith.constant dense<0.000000e+00> : vector<128xf32>
    %99 = vector.multi_reduction <add>, %98, %cst_37 [0] : vector<8x128xf32> to vector<128xf32>
    %100 = vector.shape_cast %99 : vector<128xf32> to vector<1x128xf32>
    %cst_38 = arith.constant 1.250000e-01 : f32
    %101 = vector.broadcast %cst_38 : f32 to vector<1x128xf32>
    %102 = arith.mulf %100, %101 : vector<1x128xf32>
    %103 = vector.extract_strided_slice %91 {offsets = [0, 0], sizes = [1, 128], strides = [1, 1]} : vector<2x128xf32> to vector<1x128xf32>
    %cst_39 = arith.constant 9.99999974E-6 : f32
    %104 = vector.broadcast %cst_39 : f32 to vector<1x128xf32>
    %105 = arith.addf %102, %104 : vector<1x128xf32>
    %106 = math.rsqrt %105 : vector<1x128xf32>
    %107 = arith.mulf %103, %106 : vector<1x128xf32>
    %108 = vector.broadcast %107 : vector<1x128xf32> to vector<8x128xf32>
    %109 = arith.mulf %97, %108 : vector<8x128xf32>
    %110 = vector.extract_strided_slice %91 {offsets = [1, 0], sizes = [1, 128], strides = [1, 1]} : vector<2x128xf32> to vector<1x128xf32>
    %111 = vector.broadcast %110 : vector<1x128xf32> to vector<8x128xf32>
    %112 = arith.addf %109, %111 : vector<8x128xf32>
    %c640 = arith.constant 640 : index
    %c0_40 = arith.constant 0 : index
    %113 = vector.load %arg3[%c640, %c0_40] : memref<1664x128xbf16, #tpu.memory_space<vmem>>, vector<128x128xbf16>
    %114 = arith.truncf %112 : vector<8x128xf32> to vector<8x128xbf16>
    %cst_41 = arith.constant dense<0.000000e+00> : vector<8x128xf32>
    %115 = tpu.matmul %114, %113, %cst_41 {dimension_numbers = #tpu.dot_dimension_numbers<[1], [0], [0], [1], [0, 0, 1, 1], [], []>} : vector<8x128xbf16>, vector<128x128xbf16>, vector<8x128xf32> -> vector<8x128xf32>
    %cst_42 = arith.constant 0.00999999977 : f32
    %116 = vector.broadcast %cst_42 : f32 to vector<8x128xf32>
    %117 = arith.mulf %116, %115 : vector<8x128xf32>
    %118 = arith.maximumf %115, %117 : vector<8x128xf32>
    %c6 = arith.constant 6 : index
    %c0_43 = arith.constant 0 : index
    %119 = vector.load %arg4[%c6, %c0_43] : memref<21x128xf32, #tpu.memory_space<vmem>>, vector<2x128xf32>
    %cst_44 = arith.constant dense<0.000000e+00> : vector<128xf32>
    %120 = vector.multi_reduction <add>, %118, %cst_44 [0] : vector<8x128xf32> to vector<128xf32>
    %121 = vector.shape_cast %120 : vector<128xf32> to vector<1x128xf32>
    %cst_45 = arith.constant 1.250000e-01 : f32
    %122 = vector.broadcast %cst_45 : f32 to vector<1x128xf32>
    %123 = arith.mulf %121, %122 : vector<1x128xf32>
    %124 = vector.broadcast %123 : vector<1x128xf32> to vector<8x128xf32>
    %125 = arith.subf %118, %124 : vector<8x128xf32>
    %126 = arith.mulf %125, %125 : vector<8x128xf32>
    %cst_46 = arith.constant dense<0.000000e+00> : vector<128xf32>
    %127 = vector.multi_reduction <add>, %126, %cst_46 [0] : vector<8x128xf32> to vector<128xf32>
    %128 = vector.shape_cast %127 : vector<128xf32> to vector<1x128xf32>
    %cst_47 = arith.constant 1.250000e-01 : f32
    %129 = vector.broadcast %cst_47 : f32 to vector<1x128xf32>
    %130 = arith.mulf %128, %129 : vector<1x128xf32>
    %131 = vector.extract_strided_slice %119 {offsets = [0, 0], sizes = [1, 128], strides = [1, 1]} : vector<2x128xf32> to vector<1x128xf32>
    %cst_48 = arith.constant 9.99999974E-6 : f32
    %132 = vector.broadcast %cst_48 : f32 to vector<1x128xf32>
    %133 = arith.addf %130, %132 : vector<1x128xf32>
    %134 = math.rsqrt %133 : vector<1x128xf32>
    %135 = arith.mulf %131, %134 : vector<1x128xf32>
    %136 = vector.broadcast %135 : vector<1x128xf32> to vector<8x128xf32>
    %137 = arith.mulf %125, %136 : vector<8x128xf32>
    %138 = vector.extract_strided_slice %119 {offsets = [1, 0], sizes = [1, 128], strides = [1, 1]} : vector<2x128xf32> to vector<1x128xf32>
    %139 = vector.broadcast %138 : vector<1x128xf32> to vector<8x128xf32>
    %140 = arith.addf %137, %139 : vector<8x128xf32>
    %c768 = arith.constant 768 : index
    %c0_49 = arith.constant 0 : index
    %141 = vector.load %arg3[%c768, %c0_49] : memref<1664x128xbf16, #tpu.memory_space<vmem>>, vector<128x128xbf16>
    %142 = arith.truncf %140 : vector<8x128xf32> to vector<8x128xbf16>
    %cst_50 = arith.constant dense<0.000000e+00> : vector<8x128xf32>
    %143 = tpu.matmul %142, %141, %cst_50 {dimension_numbers = #tpu.dot_dimension_numbers<[1], [0], [0], [1], [0, 0, 1, 1], [], []>} : vector<8x128xbf16>, vector<128x128xbf16>, vector<8x128xf32> -> vector<8x128xf32>
    %cst_51 = arith.constant 0.00999999977 : f32
    %144 = vector.broadcast %cst_51 : f32 to vector<8x128xf32>
    %145 = arith.mulf %144, %143 : vector<8x128xf32>
    %146 = arith.maximumf %143, %145 : vector<8x128xf32>
    %c8 = arith.constant 8 : index
    %c0_52 = arith.constant 0 : index
    %147 = vector.load %arg4[%c8, %c0_52] : memref<21x128xf32, #tpu.memory_space<vmem>>, vector<2x128xf32>
    %cst_53 = arith.constant dense<0.000000e+00> : vector<128xf32>
    %148 = vector.multi_reduction <add>, %146, %cst_53 [0] : vector<8x128xf32> to vector<128xf32>
    %149 = vector.shape_cast %148 : vector<128xf32> to vector<1x128xf32>
    %cst_54 = arith.constant 1.250000e-01 : f32
    %150 = vector.broadcast %cst_54 : f32 to vector<1x128xf32>
    %151 = arith.mulf %149, %150 : vector<1x128xf32>
    %152 = vector.broadcast %151 : vector<1x128xf32> to vector<8x128xf32>
    %153 = arith.subf %146, %152 : vector<8x128xf32>
    %154 = arith.mulf %153, %153 : vector<8x128xf32>
    %cst_55 = arith.constant dense<0.000000e+00> : vector<128xf32>
    %155 = vector.multi_reduction <add>, %154, %cst_55 [0] : vector<8x128xf32> to vector<128xf32>
    %156 = vector.shape_cast %155 : vector<128xf32> to vector<1x128xf32>
    %cst_56 = arith.constant 1.250000e-01 : f32
    %157 = vector.broadcast %cst_56 : f32 to vector<1x128xf32>
    %158 = arith.mulf %156, %157 : vector<1x128xf32>
    %159 = vector.extract_strided_slice %147 {offsets = [0, 0], sizes = [1, 128], strides = [1, 1]} : vector<2x128xf32> to vector<1x128xf32>
    %cst_57 = arith.constant 9.99999974E-6 : f32
    %160 = vector.broadcast %cst_57 : f32 to vector<1x128xf32>
    %161 = arith.addf %158, %160 : vector<1x128xf32>
    %162 = math.rsqrt %161 : vector<1x128xf32>
    %163 = arith.mulf %159, %162 : vector<1x128xf32>
    %164 = vector.broadcast %163 : vector<1x128xf32> to vector<8x128xf32>
    %165 = arith.mulf %153, %164 : vector<8x128xf32>
    %166 = vector.extract_strided_slice %147 {offsets = [1, 0], sizes = [1, 128], strides = [1, 1]} : vector<2x128xf32> to vector<1x128xf32>
    %167 = vector.broadcast %166 : vector<1x128xf32> to vector<8x128xf32>
    %168 = arith.addf %165, %167 : vector<8x128xf32>
    %c896 = arith.constant 896 : index
    %c0_58 = arith.constant 0 : index
    %169 = vector.load %arg3[%c896, %c0_58] : memref<1664x128xbf16, #tpu.memory_space<vmem>>, vector<128x128xbf16>
    %170 = arith.truncf %168 : vector<8x128xf32> to vector<8x128xbf16>
    %cst_59 = arith.constant dense<0.000000e+00> : vector<8x128xf32>
    %171 = tpu.matmul %170, %169, %cst_59 {dimension_numbers = #tpu.dot_dimension_numbers<[1], [0], [0], [1], [0, 0, 1, 1], [], []>} : vector<8x128xbf16>, vector<128x128xbf16>, vector<8x128xf32> -> vector<8x128xf32>
    %cst_60 = arith.constant 0.00999999977 : f32
    %172 = vector.broadcast %cst_60 : f32 to vector<8x128xf32>
    %173 = arith.mulf %172, %171 : vector<8x128xf32>
    %174 = arith.maximumf %171, %173 : vector<8x128xf32>
    %c10 = arith.constant 10 : index
    %c0_61 = arith.constant 0 : index
    %175 = vector.load %arg4[%c10, %c0_61] : memref<21x128xf32, #tpu.memory_space<vmem>>, vector<2x128xf32>
    %cst_62 = arith.constant dense<0.000000e+00> : vector<128xf32>
    %176 = vector.multi_reduction <add>, %174, %cst_62 [0] : vector<8x128xf32> to vector<128xf32>
    %177 = vector.shape_cast %176 : vector<128xf32> to vector<1x128xf32>
    %cst_63 = arith.constant 1.250000e-01 : f32
    %178 = vector.broadcast %cst_63 : f32 to vector<1x128xf32>
    %179 = arith.mulf %177, %178 : vector<1x128xf32>
    %180 = vector.broadcast %179 : vector<1x128xf32> to vector<8x128xf32>
    %181 = arith.subf %174, %180 : vector<8x128xf32>
    %182 = arith.mulf %181, %181 : vector<8x128xf32>
    %cst_64 = arith.constant dense<0.000000e+00> : vector<128xf32>
    %183 = vector.multi_reduction <add>, %182, %cst_64 [0] : vector<8x128xf32> to vector<128xf32>
    %184 = vector.shape_cast %183 : vector<128xf32> to vector<1x128xf32>
    %cst_65 = arith.constant 1.250000e-01 : f32
    %185 = vector.broadcast %cst_65 : f32 to vector<1x128xf32>
    %186 = arith.mulf %184, %185 : vector<1x128xf32>
    %187 = vector.extract_strided_slice %175 {offsets = [0, 0], sizes = [1, 128], strides = [1, 1]} : vector<2x128xf32> to vector<1x128xf32>
    %cst_66 = arith.constant 9.99999974E-6 : f32
    %188 = vector.broadcast %cst_66 : f32 to vector<1x128xf32>
    %189 = arith.addf %186, %188 : vector<1x128xf32>
    %190 = math.rsqrt %189 : vector<1x128xf32>
    %191 = arith.mulf %187, %190 : vector<1x128xf32>
    %192 = vector.broadcast %191 : vector<1x128xf32> to vector<8x128xf32>
    %193 = arith.mulf %181, %192 : vector<8x128xf32>
    %194 = vector.extract_strided_slice %175 {offsets = [1, 0], sizes = [1, 128], strides = [1, 1]} : vector<2x128xf32> to vector<1x128xf32>
    %195 = vector.broadcast %194 : vector<1x128xf32> to vector<8x128xf32>
    %196 = arith.addf %193, %195 : vector<8x128xf32>
    %c1024 = arith.constant 1024 : index
    %c0_67 = arith.constant 0 : index
    %197 = vector.load %arg3[%c1024, %c0_67] : memref<1664x128xbf16, #tpu.memory_space<vmem>>, vector<128x128xbf16>
    %198 = arith.truncf %196 : vector<8x128xf32> to vector<8x128xbf16>
    %cst_68 = arith.constant dense<0.000000e+00> : vector<8x128xf32>
    %199 = tpu.matmul %198, %197, %cst_68 {dimension_numbers = #tpu.dot_dimension_numbers<[1], [0], [0], [1], [0, 0, 1, 1], [], []>} : vector<8x128xbf16>, vector<128x128xbf16>, vector<8x128xf32> -> vector<8x128xf32>
    %cst_69 = arith.constant 0.00999999977 : f32
    %200 = vector.broadcast %cst_69 : f32 to vector<8x128xf32>
    %201 = arith.mulf %200, %199 : vector<8x128xf32>
    %202 = arith.maximumf %199, %201 : vector<8x128xf32>
    %c12 = arith.constant 12 : index
    %c0_70 = arith.constant 0 : index
    %203 = vector.load %arg4[%c12, %c0_70] : memref<21x128xf32, #tpu.memory_space<vmem>>, vector<2x128xf32>
    %cst_71 = arith.constant dense<0.000000e+00> : vector<128xf32>
    %204 = vector.multi_reduction <add>, %202, %cst_71 [0] : vector<8x128xf32> to vector<128xf32>
    %205 = vector.shape_cast %204 : vector<128xf32> to vector<1x128xf32>
    %cst_72 = arith.constant 1.250000e-01 : f32
    %206 = vector.broadcast %cst_72 : f32 to vector<1x128xf32>
    %207 = arith.mulf %205, %206 : vector<1x128xf32>
    %208 = vector.broadcast %207 : vector<1x128xf32> to vector<8x128xf32>
    %209 = arith.subf %202, %208 : vector<8x128xf32>
    %210 = arith.mulf %209, %209 : vector<8x128xf32>
    %cst_73 = arith.constant dense<0.000000e+00> : vector<128xf32>
    %211 = vector.multi_reduction <add>, %210, %cst_73 [0] : vector<8x128xf32> to vector<128xf32>
    %212 = vector.shape_cast %211 : vector<128xf32> to vector<1x128xf32>
    %cst_74 = arith.constant 1.250000e-01 : f32
    %213 = vector.broadcast %cst_74 : f32 to vector<1x128xf32>
    %214 = arith.mulf %212, %213 : vector<1x128xf32>
    %215 = vector.extract_strided_slice %203 {offsets = [0, 0], sizes = [1, 128], strides = [1, 1]} : vector<2x128xf32> to vector<1x128xf32>
    %cst_75 = arith.constant 9.99999974E-6 : f32
    %216 = vector.broadcast %cst_75 : f32 to vector<1x128xf32>
    %217 = arith.addf %214, %216 : vector<1x128xf32>
    %218 = math.rsqrt %217 : vector<1x128xf32>
    %219 = arith.mulf %215, %218 : vector<1x128xf32>
    %220 = vector.broadcast %219 : vector<1x128xf32> to vector<8x128xf32>
    %221 = arith.mulf %209, %220 : vector<8x128xf32>
    %222 = vector.extract_strided_slice %203 {offsets = [1, 0], sizes = [1, 128], strides = [1, 1]} : vector<2x128xf32> to vector<1x128xf32>
    %223 = vector.broadcast %222 : vector<1x128xf32> to vector<8x128xf32>
    %224 = arith.addf %221, %223 : vector<8x128xf32>
    %c1152 = arith.constant 1152 : index
    %c0_76 = arith.constant 0 : index
    %225 = vector.load %arg3[%c1152, %c0_76] : memref<1664x128xbf16, #tpu.memory_space<vmem>>, vector<128x128xbf16>
    %226 = arith.truncf %224 : vector<8x128xf32> to vector<8x128xbf16>
    %cst_77 = arith.constant dense<0.000000e+00> : vector<8x128xf32>
    %227 = tpu.matmul %226, %225, %cst_77 {dimension_numbers = #tpu.dot_dimension_numbers<[1], [0], [0], [1], [0, 0, 1, 1], [], []>} : vector<8x128xbf16>, vector<128x128xbf16>, vector<8x128xf32> -> vector<8x128xf32>
    %cst_78 = arith.constant 0.00999999977 : f32
    %228 = vector.broadcast %cst_78 : f32 to vector<8x128xf32>
    %229 = arith.mulf %228, %227 : vector<8x128xf32>
    %230 = arith.maximumf %227, %229 : vector<8x128xf32>
    %c14 = arith.constant 14 : index
    %c0_79 = arith.constant 0 : index
    %231 = vector.load %arg4[%c14, %c0_79] : memref<21x128xf32, #tpu.memory_space<vmem>>, vector<2x128xf32>
    %cst_80 = arith.constant dense<0.000000e+00> : vector<128xf32>
    %232 = vector.multi_reduction <add>, %230, %cst_80 [0] : vector<8x128xf32> to vector<128xf32>
    %233 = vector.shape_cast %232 : vector<128xf32> to vector<1x128xf32>
    %cst_81 = arith.constant 1.250000e-01 : f32
    %234 = vector.broadcast %cst_81 : f32 to vector<1x128xf32>
    %235 = arith.mulf %233, %234 : vector<1x128xf32>
    %236 = vector.broadcast %235 : vector<1x128xf32> to vector<8x128xf32>
    %237 = arith.subf %230, %236 : vector<8x128xf32>
    %238 = arith.mulf %237, %237 : vector<8x128xf32>
    %cst_82 = arith.constant dense<0.000000e+00> : vector<128xf32>
    %239 = vector.multi_reduction <add>, %238, %cst_82 [0] : vector<8x128xf32> to vector<128xf32>
    %240 = vector.shape_cast %239 : vector<128xf32> to vector<1x128xf32>
    %cst_83 = arith.constant 1.250000e-01 : f32
    %241 = vector.broadcast %cst_83 : f32 to vector<1x128xf32>
    %242 = arith.mulf %240, %241 : vector<1x128xf32>
    %243 = vector.extract_strided_slice %231 {offsets = [0, 0], sizes = [1, 128], strides = [1, 1]} : vector<2x128xf32> to vector<1x128xf32>
    %cst_84 = arith.constant 9.99999974E-6 : f32
    %244 = vector.broadcast %cst_84 : f32 to vector<1x128xf32>
    %245 = arith.addf %242, %244 : vector<1x128xf32>
    %246 = math.rsqrt %245 : vector<1x128xf32>
    %247 = arith.mulf %243, %246 : vector<1x128xf32>
    %248 = vector.broadcast %247 : vector<1x128xf32> to vector<8x128xf32>
    %249 = arith.mulf %237, %248 : vector<8x128xf32>
    %250 = vector.extract_strided_slice %231 {offsets = [1, 0], sizes = [1, 128], strides = [1, 1]} : vector<2x128xf32> to vector<1x128xf32>
    %251 = vector.broadcast %250 : vector<1x128xf32> to vector<8x128xf32>
    %252 = arith.addf %249, %251 : vector<8x128xf32>
    %c1280 = arith.constant 1280 : index
    %c0_85 = arith.constant 0 : index
    %253 = vector.load %arg3[%c1280, %c0_85] : memref<1664x128xbf16, #tpu.memory_space<vmem>>, vector<128x128xbf16>
    %254 = arith.truncf %252 : vector<8x128xf32> to vector<8x128xbf16>
    %cst_86 = arith.constant dense<0.000000e+00> : vector<8x128xf32>
    %255 = tpu.matmul %254, %253, %cst_86 {dimension_numbers = #tpu.dot_dimension_numbers<[1], [0], [0], [1], [0, 0, 1, 1], [], []>} : vector<8x128xbf16>, vector<128x128xbf16>, vector<8x128xf32> -> vector<8x128xf32>
    %cst_87 = arith.constant 0.00999999977 : f32
    %256 = vector.broadcast %cst_87 : f32 to vector<8x128xf32>
    %257 = arith.mulf %256, %255 : vector<8x128xf32>
    %258 = arith.maximumf %255, %257 : vector<8x128xf32>
    %c16 = arith.constant 16 : index
    %c0_88 = arith.constant 0 : index
    %259 = vector.load %arg4[%c16, %c0_88] : memref<21x128xf32, #tpu.memory_space<vmem>>, vector<2x128xf32>
    %cst_89 = arith.constant dense<0.000000e+00> : vector<128xf32>
    %260 = vector.multi_reduction <add>, %258, %cst_89 [0] : vector<8x128xf32> to vector<128xf32>
    %261 = vector.shape_cast %260 : vector<128xf32> to vector<1x128xf32>
    %cst_90 = arith.constant 1.250000e-01 : f32
    %262 = vector.broadcast %cst_90 : f32 to vector<1x128xf32>
    %263 = arith.mulf %261, %262 : vector<1x128xf32>
    %264 = vector.broadcast %263 : vector<1x128xf32> to vector<8x128xf32>
    %265 = arith.subf %258, %264 : vector<8x128xf32>
    %266 = arith.mulf %265, %265 : vector<8x128xf32>
    %cst_91 = arith.constant dense<0.000000e+00> : vector<128xf32>
    %267 = vector.multi_reduction <add>, %266, %cst_91 [0] : vector<8x128xf32> to vector<128xf32>
    %268 = vector.shape_cast %267 : vector<128xf32> to vector<1x128xf32>
    %cst_92 = arith.constant 1.250000e-01 : f32
    %269 = vector.broadcast %cst_92 : f32 to vector<1x128xf32>
    %270 = arith.mulf %268, %269 : vector<1x128xf32>
    %271 = vector.extract_strided_slice %259 {offsets = [0, 0], sizes = [1, 128], strides = [1, 1]} : vector<2x128xf32> to vector<1x128xf32>
    %cst_93 = arith.constant 9.99999974E-6 : f32
    %272 = vector.broadcast %cst_93 : f32 to vector<1x128xf32>
    %273 = arith.addf %270, %272 : vector<1x128xf32>
    %274 = math.rsqrt %273 : vector<1x128xf32>
    %275 = arith.mulf %271, %274 : vector<1x128xf32>
    %276 = vector.broadcast %275 : vector<1x128xf32> to vector<8x128xf32>
    %277 = arith.mulf %265, %276 : vector<8x128xf32>
    %278 = vector.extract_strided_slice %259 {offsets = [1, 0], sizes = [1, 128], strides = [1, 1]} : vector<2x128xf32> to vector<1x128xf32>
    %279 = vector.broadcast %278 : vector<1x128xf32> to vector<8x128xf32>
    %280 = arith.addf %277, %279 : vector<8x128xf32>
    %c1408 = arith.constant 1408 : index
    %c0_94 = arith.constant 0 : index
    %281 = vector.load %arg3[%c1408, %c0_94] : memref<1664x128xbf16, #tpu.memory_space<vmem>>, vector<128x128xbf16>
    %282 = arith.truncf %280 : vector<8x128xf32> to vector<8x128xbf16>
    %cst_95 = arith.constant dense<0.000000e+00> : vector<8x128xf32>
    %283 = tpu.matmul %282, %281, %cst_95 {dimension_numbers = #tpu.dot_dimension_numbers<[1], [0], [0], [1], [0, 0, 1, 1], [], []>} : vector<8x128xbf16>, vector<128x128xbf16>, vector<8x128xf32> -> vector<8x128xf32>
    %cst_96 = arith.constant 0.00999999977 : f32
    %284 = vector.broadcast %cst_96 : f32 to vector<8x128xf32>
    %285 = arith.mulf %284, %283 : vector<8x128xf32>
    %286 = arith.maximumf %283, %285 : vector<8x128xf32>
    %c18 = arith.constant 18 : index
    %c0_97 = arith.constant 0 : index
    %287 = vector.load %arg4[%c18, %c0_97] : memref<21x128xf32, #tpu.memory_space<vmem>>, vector<2x128xf32>
    %cst_98 = arith.constant dense<0.000000e+00> : vector<128xf32>
    %288 = vector.multi_reduction <add>, %286, %cst_98 [0] : vector<8x128xf32> to vector<128xf32>
    %289 = vector.shape_cast %288 : vector<128xf32> to vector<1x128xf32>
    %cst_99 = arith.constant 1.250000e-01 : f32
    %290 = vector.broadcast %cst_99 : f32 to vector<1x128xf32>
    %291 = arith.mulf %289, %290 : vector<1x128xf32>
    %292 = vector.broadcast %291 : vector<1x128xf32> to vector<8x128xf32>
    %293 = arith.subf %286, %292 : vector<8x128xf32>
    %294 = arith.mulf %293, %293 : vector<8x128xf32>
    %cst_100 = arith.constant dense<0.000000e+00> : vector<128xf32>
    %295 = vector.multi_reduction <add>, %294, %cst_100 [0] : vector<8x128xf32> to vector<128xf32>
    %296 = vector.shape_cast %295 : vector<128xf32> to vector<1x128xf32>
    %cst_101 = arith.constant 1.250000e-01 : f32
    %297 = vector.broadcast %cst_101 : f32 to vector<1x128xf32>
    %298 = arith.mulf %296, %297 : vector<1x128xf32>
    %299 = vector.extract_strided_slice %287 {offsets = [0, 0], sizes = [1, 128], strides = [1, 1]} : vector<2x128xf32> to vector<1x128xf32>
    %cst_102 = arith.constant 9.99999974E-6 : f32
    %300 = vector.broadcast %cst_102 : f32 to vector<1x128xf32>
    %301 = arith.addf %298, %300 : vector<1x128xf32>
    %302 = math.rsqrt %301 : vector<1x128xf32>
    %303 = arith.mulf %299, %302 : vector<1x128xf32>
    %304 = vector.broadcast %303 : vector<1x128xf32> to vector<8x128xf32>
    %305 = arith.mulf %293, %304 : vector<8x128xf32>
    %306 = vector.extract_strided_slice %287 {offsets = [1, 0], sizes = [1, 128], strides = [1, 1]} : vector<2x128xf32> to vector<1x128xf32>
    %307 = vector.broadcast %306 : vector<1x128xf32> to vector<8x128xf32>
    %308 = arith.addf %305, %307 : vector<8x128xf32>
    %c1536 = arith.constant 1536 : index
    %c0_103 = arith.constant 0 : index
    %309 = vector.load %arg3[%c1536, %c0_103] : memref<1664x128xbf16, #tpu.memory_space<vmem>>, vector<128x128xbf16>
    %310 = arith.truncf %308 : vector<8x128xf32> to vector<8x128xbf16>
    %cst_104 = arith.constant dense<0.000000e+00> : vector<8x128xf32>
    %311 = tpu.matmul %310, %309, %cst_104 {dimension_numbers = #tpu.dot_dimension_numbers<[1], [0], [0], [1], [0, 0, 1, 1], [], []>} : vector<8x128xbf16>, vector<128x128xbf16>, vector<8x128xf32> -> vector<8x128xf32>
    %c20 = arith.constant 20 : index
    %c0_105 = arith.constant 0 : index
    %312 = vector.load %arg4[%c20, %c0_105] : memref<21x128xf32, #tpu.memory_space<vmem>>, vector<1x128xf32>
    %313 = vector.broadcast %312 : vector<1x128xf32> to vector<8x128xf32>
    %314 = arith.addf %311, %313 : vector<8x128xf32>
    %c0_106 = arith.constant 0 : index
    %c0_107 = arith.constant 0 : index
    %315 = vector.load %arg5[%c0_106, %c0_107] : memref<8x128xf32, #tpu.memory_space<vmem>>, vector<8x128xf32>
    tpu.vector_store %arg5[%c0_106, %c0_107], %314 {strides = array<i32>} : memref<8x128xf32, #tpu.memory_space<vmem>>, vector<8x128xf32>,
    return
  }
}

</mosaic_0001>

<bundles_post_ra>
// kernel: fwd.1
= control target key start
LH: loop header
LB: loop body
LE: loop exit
PB: predicated region body
PF: predicated region fallthrough
CT: control target
= control target key end

     0   :  { %10 = vsyncpa [#allocation3], 0  ;;  %s2616_s0 = inlined_call_operand.vmem [shape: f32[8,128], index: 0, kind: input, shape index: {}]   ;;  %s2617_s1 = inlined_call_operand.hbm [shape: bf16[128,384], index: 1, kind: input, shape index: {}]   ;;  %s2618_s2 = inlined_call_operand.vmem [shape: f32[2,384], index: 2, kind: input, shape index: {}]   ;;  %s2619_s3 = inlined_call_operand.hbm [shape: bf16[1664,128], index: 3, kind: input, shape index: {}]   ;;  %s2620_s4 = inlined_call_operand.vmem [shape: f32[21,128], index: 4, kind: input, shape index: {}]   ;;  %s2621_s5 = inlined_call_operand.hbm [shape: f32[8,128], index: 5, kind: output, shape index: {}]  }
   0x1   :  { %11 = vsyncpa [#allocation6], 0 }
   0x2   :  { %12 = vsyncpa [#allocation4], 0  ;;  %s19_s20 = sshll.u32 %s2617_s1, 4  ;;  %s2516_s21 = smov [#allocation2]   ;;  %s20_s20 = int_to_ptr.hbm [resolvable:$true] %s19_s20 }
   0x3   :  { %s21_s22 = sshll.u32 %s2516_s21, 4  ;;  %s34_s25 = sshll.u32 %s2619_s3, 4  ;;  %s22_s22 = int_to_ptr.vmem [resolvable:$true] %s21_s22  ;;  %s35_s25 = int_to_ptr.hbm [resolvable:$true] %s34_s25 }
   0x4   :  { %s2517_s26 = smov 192   ;;  %s2518_s27 = smov 12  }
   0x5   :  { %27 = dma.hbm_to_vmem [thread:$0]  %s20_s20, 3072, %s22_s22, [#allocation3], %s2517_s26, %s2517_s26, %s2518_s27  }
   0x6   :  { %s2519_s28 = smov [#allocation5]   ;;  %s2520_s30 = smov 64  }
   0x7   :  { %s36_s29 = sshll.u32 %s2519_s28, 4  ;;  %s2521_s6 = smov 4   ;;  %s37_s29 = int_to_ptr.vmem [resolvable:$true] %s36_s29 }
   0x8   :  { %42 = dma.hbm_to_vmem [thread:$0]  %s35_s25, 13312, %s37_s29, [#allocation6], %s2520_s30, %s2520_s30, %s2521_s6  }
   0x9   :  { %2510 = dma.done.wait [#allocation3], 3072  }
   0xa   :  { %2511 = vsyncadd [#allocation3], 4294964224 }
   0xb   :  { %2512 = dma.done.wait [#allocation6], 13312  }
   0xc   :  { %2513 = vsyncadd [#allocation6], 4294953984  ;;  %v1850_v0 = vld [vmem:[#allocation2 + $0xa8] sm:$0xf]  ;;  %v2298_v1 = vld [vmem:[#allocation2 + $0xb0] sm:$0xf0] }
   0xd   :  { %v2297_v2 = vld [vmem:[#allocation2 + $0xac] sm:$0xf]  ;;  %v1851_v3 = vor.u32 %v2298_v1, %v1850_v0  ;;  %v1852_v4 = vld [vmem:[#allocation2 + $0xb4] sm:$0xf0]  ;;  %v1858_v5 = vld [vmem:[#allocation2 + $0xb0] sm:$0xf] }
   0xe   :  { %v2299_v6 = vld [vmem:[#allocation2 + $0xb8] sm:$0xf0]  ;;  %v1855_v7 = vor.u32 %v2297_v2, %v1852_v4  ;;  %v1838_v9 = vld [vmem:[#allocation2 + $0x90] sm:$0xf]  ;;  %v2294_v11 = vld [vmem:[#allocation2 + $0x94] sm:$0xf] }
   0xf   :  { %v1859_v8 = vor.u32 %v2299_v6, %v1858_v5  ;;  %v2295_v10 = vld [vmem:[#allocation2 + $0x98] sm:$0xf0]  ;;  %215 = vmatpush.bf16.msra.mxu0 %v1851_v3  ;;  %v1840_v13 = vld [vmem:[#allocation2 + $0x9c] sm:$0xf0]  ;;  %v1846_v14 = vld [vmem:[#allocation2 + $0x98] sm:$0xf] }
  0x10   :  { %v1839_v12 = vor.u32 %v2295_v10, %v1838_v9  ;;  %v2296_v15 = vld [vmem:[#allocation2 + $0xa0] sm:$0xf0]  ;;  %228 = vmatpush.bf16.msra.mxu1 %v1855_v7  ;;  %v1843_v16 = vor.u32 %v2294_v11, %v1840_v13  ;;  %v1826_v18 = vld [vmem:[#allocation2 + $0x78] sm:$0xf]  ;;  %v2291_v20 = vld [vmem:[#allocation2 + $0x7c] sm:$0xf] }
  0x11   :  { %241 = vmatpush.bf16.msra.mxu2 %v1859_v8  ;;  %v1847_v17 = vor.u32 %v2296_v15, %v1846_v14  ;;  %v2292_v19 = vld [vmem:[#allocation2 + $0x80] sm:$0xf0]  ;;  %v1828_v21 = vld [vmem:[#allocation2 + $0x84] sm:$0xf0]  ;;  %v1834_v22 = vld [vmem:[#allocation2 + $0x80] sm:$0xf] }
  0x12   :  { %v2293_v23 = vld [vmem:[#allocation2 + $0x88] sm:$0xf0]  ;;  %v1827_v24 = vor.u32 %v2292_v19, %v1826_v18  ;;  %v1831_v25 = vor.u32 %v2291_v20, %v1828_v21  ;;  %v1814_v27 = vld [vmem:[#allocation2 + $0x60] sm:$0xf]  ;;  %v2288_v29 = vld [vmem:[#allocation2 + $0x64] sm:$0xf] }
  0x13   :  { %216 = vmatpush.bf16.msra.mxu0 %v1839_v12  ;;  %v1835_v26 = vor.u32 %v2293_v23, %v1834_v22  ;;  %v2289_v28 = vld [vmem:[#allocation2 + $0x68] sm:$0xf0]  ;;  %v1816_v30 = vld [vmem:[#allocation2 + $0x6c] sm:$0xf0]  ;;  %v1822_v31 = vld [vmem:[#allocation2 + $0x68] sm:$0xf] }
  0x14   :  { %229 = vmatpush.bf16.msra.mxu1 %v1843_v16  ;;  %v2290_v32 = vld [vmem:[#allocation2 + $0x70] sm:$0xf0]  ;;  %v1815_v33 = vor.u32 %v2289_v28, %v1814_v27  ;;  %v1819_v34 = vor.u32 %v2288_v29, %v1816_v30  ;;  %v1802_v36 = vld [vmem:[#allocation2 + $0x48] sm:$0xf]  ;;  %v2285_v38 = vld [vmem:[#allocation2 + $0x4c] sm:$0xf] }
  0x15   :  { %242 = vmatpush.bf16.msra.mxu2 %v1847_v17  ;;  %v1823_v35 = vor.u32 %v2290_v32, %v1822_v31  ;;  %v2286_v37 = vld [vmem:[#allocation2 + $0x50] sm:$0xf0]  ;;  %v1804_v39 = vld [vmem:[#allocation2 + $0x54] sm:$0xf0]  ;;  %v1810_v40 = vld [vmem:[#allocation2 + $0x50] sm:$0xf] }
  0x16   :  { %v2287_v41 = vld [vmem:[#allocation2 + $0x58] sm:$0xf0]  ;;  %v1803_v42 = vor.u32 %v2286_v37, %v1802_v36  ;;  %v1790_v43 = vld [vmem:[#allocation2 + $0x30] sm:$0xf]  ;;  %v1807_v44 = vor.u32 %v2285_v38, %v1804_v39  ;;  %v2282_v47 = vld [vmem:[#allocation2 + $0x34] sm:$0xf] }
  0x17   :  { %217 = vmatpush.bf16.msra.mxu0 %v1827_v24  ;;  %v1811_v45 = vor.u32 %v2287_v41, %v1810_v40  ;;  %v2283_v46 = vld [vmem:[#allocation2 + $0x38] sm:$0xf0]  ;;  %v1792_v48 = vld [vmem:[#allocation2 + $0x3c] sm:$0xf0]  ;;  %v1798_v49 = vld [vmem:[#allocation2 + $0x38] sm:$0xf] }
  0x18   :  { %230 = vmatpush.bf16.msra.mxu1 %v1831_v25  ;;  %v2284_v50 = vld [vmem:[#allocation2 + $0x40] sm:$0xf0]  ;;  %v1791_v51 = vor.u32 %v2283_v46, %v1790_v43  ;;  %v1795_v52 = vor.u32 %v2282_v47, %v1792_v48  ;;  %v1778_v54 = vld [vmem:[#allocation2 + $0x18] sm:$0xf]  ;;  %v2279_v56 = vld [vmem:[#allocation2 + $0x1c] sm:$0xf] }
  0x19   :  { %243 = vmatpush.bf16.msra.mxu2 %v1835_v26  ;;  %v1799_v53 = vor.u32 %v2284_v50, %v1798_v49  ;;  %v2280_v55 = vld [vmem:[#allocation2 + $0x20] sm:$0xf0]  ;;  %v1780_v57 = vld [vmem:[#allocation2 + $0x24] sm:$0xf0]  ;;  %v1786_v58 = vld [vmem:[#allocation2 + $0x20] sm:$0xf] }
  0x1a   :  { %v2281_v59 = vld [vmem:[#allocation2 + $0x28] sm:$0xf0]  ;;  %v1779_v60 = vor.u32 %v2280_v55, %v1778_v54  ;;  %v1783_v61 = vor.u32 %v2279_v56, %v1780_v57  ;;  %v1766_v63 = vld [vmem:[#allocation2] sm:$0xf]  ;;  %v2276_v1 = vld [vmem:[#allocation2 + $0x4] sm:$0xf] }
  0x1b   :  { %218 = vmatpush.bf16.msra.mxu0 %v1815_v33  ;;  %v1787_v62 = vor.u32 %v2281_v59, %v1786_v58  ;;  %v2277_v0 = vld [vmem:[#allocation2 + $0x8] sm:$0xf0]  ;;  %v1768_v2 = vld [vmem:[#allocation2 + $0xc] sm:$0xf0]  ;;  %v1774_v3 = vld [vmem:[#allocation2 + $0x8] sm:$0xf] }
  0x1c   :  { %231 = vmatpush.bf16.msra.mxu1 %v1819_v34  ;;  %v2278_v4 = vld [vmem:[#allocation2 + $0x10] sm:$0xf0]  ;;  %v1767_v5 = vor.u32 %v2277_v0, %v1766_v63  ;;  %v53_v6 = vld [vmem:[%s2616_s0] sm:$0xff]  ;;  %v1771_v7 = vor.u32 %v2276_v1, %v1768_v2  ;;  %v2307_v33 = vld [vmem:[#allocation5 + $0x38] sm:$0xff]  ;;  %vm347_vm8 = vcmask 1041408   ;;  %vm349_vm10 = vcmask 1043456  }
  0x1d   :  { %244 = vmatpush.bf16.msra.mxu2 %v1823_v35  ;;  %v1775_v8 = vor.u32 %v2278_v4, %v1774_v3  ;;  %v54_v9 = vpack.c.bf16 %v53_v6, %v53_v6  ;;  %v2315_v34 = vld [vmem:[#allocation5 + $0x78] sm:$0xff]  ;;  %574 = vmatpush.bf16.msra.mxu3 %v2307_v33  ;;  %v2306_v43 = vld [vmem:[#allocation5 + $0x30] sm:$0xff]  ;;  %v2321_v54 = vld [vmem:[#allocation5 + $0xa8] sm:$0xff]  ;;  %s2522_s29 = smov [#allocation7]   ;;  %s1753_s3 = sshll.u32 %s2621_s5, 4  ;;  %s1754_s3 = int_to_ptr.hbm [resolvable:$true] %s1753_s3 }
  0x1e   :  { %v2323_v35 = vld [vmem:[#allocation5 + $0xb8] sm:$0xff]  ;;  %v2320_v63 = vld [vmem:[#allocation5 + $0xa0] sm:$0xff]  ;;  %s1751_s30 = sshll.u32 %s2522_s29, 4  ;;  %s1752_s30 = int_to_ptr.vmem [resolvable:$true] %s1751_s30 }
  0x1f   :  { %219 = vmatpush.bf16.msra.mxu0 %v1803_v42  ;;  %v2303_v3 = vld [vmem:[#allocation5 + $0x18] sm:$0xff] }
  0x20   :  { %232 = vmatpush.bf16.msra.mxu1 %v1807_v44  ;;  %v2314_v44 = vld [vmem:[#allocation5 + $0x70] sm:$0xff]  ;;  %v2311_v4 = vld [vmem:[#allocation5 + $0x58] sm:$0xff] }
  0x21   :  { %245 = vmatpush.bf16.msra.mxu2 %v1811_v45  ;;  %v2322_v45 = vld [vmem:[#allocation5 + $0xb0] sm:$0xff]  ;;  %575 = vmatpush.bf16.msra.mxu3 %v2306_v43 }
  0x23   :  { %220 = vmatpush.bf16.msra.mxu0 %v1791_v51 }
  0x24   :  { %233 = vmatpush.bf16.msra.mxu1 %v1795_v52  ;;  %v2305_v52 = vld [vmem:[#allocation5 + $0x28] sm:$0xff] }
  0x25   :  { %246 = vmatpush.bf16.msra.mxu2 %v1799_v53  ;;  %v2313_v53 = vld [vmem:[#allocation5 + $0x68] sm:$0xff]  ;;  %576 = vmatpush.bf16.msra.mxu3 %v2305_v52 }
  0x27   :  { %221 = vmatpush.bf16.msra.mxu0 %v1779_v60 }
  0x28   :  { %234 = vmatpush.bf16.msra.mxu1 %v1783_v61  ;;  %v2304_v61 = vld [vmem:[#allocation5 + $0x20] sm:$0xff] }
  0x29   :  { %247 = vmatpush.bf16.msra.mxu2 %v1787_v62  ;;  %v2312_v62 = vld [vmem:[#allocation5 + $0x60] sm:$0xff]  ;;  %577 = vmatpush.bf16.msra.mxu3 %v2304_v61 }
  0x2b   :  { %222 = vmatpush.bf16.msra.mxu0 %v1767_v5  ;;  %v2319_v5 = vld [vmem:[#allocation5 + $0x98] sm:$0xff] }
  0x2c   :  { %235 = vmatpush.bf16.msra.mxu1 %v1771_v7 }
  0x2d   :  { %248 = vmatpush.bf16.msra.mxu2 %v1775_v8  ;;  %578 = vmatpush.bf16.msra.mxu3 %v2303_v3 }
  0x2e   :  { %223 = vmatmul.bf16.vlgmr.msra.gmra.mxu0 %v54_v9 }
  0x2f   :  { %236 = vmatmul.bf16.vlgmr.msra.gmra.mxu1 %v54_v9  ;;  %587 = vmatpush.bf16.msrb.mxu0 %v2315_v34 }
  0x30   :  { %249 = vmatmul.bf16.vlgmr.msra.gmra.mxu2 %v54_v9  ;;  %600 = vmatpush.bf16.msrb.mxu1 %v2323_v35 }
  0x33   :  { %588 = vmatpush.bf16.msrb.mxu0 %v2314_v44 }
  0x34   :  { %601 = vmatpush.bf16.msrb.mxu1 %v2322_v45 }
  0x37   :  { %589 = vmatpush.bf16.msrb.mxu0 %v2313_v53 }
  0x38   :  { %602 = vmatpush.bf16.msrb.mxu1 %v2321_v54 }
  0x3b   :  { %590 = vmatpush.bf16.msrb.mxu0 %v2312_v62 }
  0x3c   :  { %603 = vmatpush.bf16.msrb.mxu1 %v2320_v63 }
  0x3f   :  { %591 = vmatpush.bf16.msrb.mxu0 %v2311_v4 }
  0x40   :  { %604 = vmatpush.bf16.msrb.mxu1 %v2319_v5 }
  0xab   :  { %v224_v10 = vpop.f32.mrf.mxu0 }
  0xac   :  { %v254_v11 = vmul.f32 0.01, %v224_v10  ;;  %v237_v12 = vpop.f32.mrf.mxu1 }
  0xad   :  { %v255_v13 = vmul.f32 0.01, %v237_v12 }
  0xae   :  { %v257_v14 = vmax.f32 %v224_v10, %v254_v11 }
  0xaf   :  { %v258_v15 = vmax.f32 %v237_v12, %v255_v13  ;;  %v2302_v12 = vld [vmem:[#allocation5 + $0x10] sm:$0xff] }
  0xb0   :  { %v261_v16 = vrot.slane %v257_v14, 4  ;;  %v2310_v13 = vld [vmem:[#allocation5 + $0x50] sm:$0xff]  ;;  %579 = vmatpush.bf16.msra.mxu3 %v2302_v12 }
  0xb1   :  { %v267_v17 = vrot.slane %v258_v15, 4  ;;  %592 = vmatpush.bf16.msrb.mxu0 %v2310_v13 }
  0xb2   :  { %v262_v18 = vadd.f32 %v261_v16, %v257_v14 }
  0xb3   :  { %v250_v19 = vpop.f32.mrf.mxu2  ;;  %v268_v20 = vadd.f32 %v267_v17, %v258_v15  ;;  %v226_v22 = vpop.f32.mrf.mxu0 }
  0xb4   :  { %v256_v21 = vmul.f32 0.01, %v250_v19  ;;  %v263_v23 = vrot.slane %v262_v18, 2  ;;  %v239_v24 = vpop.f32.mrf.mxu1  ;;  %v2309_v22 = vld [vmem:[#allocation5 + $0x48] sm:$0xff] }
  0xb5   :  { %v269_v25 = vrot.slane %v268_v20, 2  ;;  %593 = vmatpush.bf16.msrb.mxu0 %v2309_v22  ;;  %v2329_v22 = vld [vmem:[#allocation5 + $0xe8] sm:$0xff] }
  0xb6   :  { %v259_v26 = vmax.f32 %v250_v19, %v256_v21  ;;  %v264_v27 = vadd.f32 %v263_v23, %v262_v18  ;;  %v2301_v21 = vld [vmem:[#allocation5 + $0x8] sm:$0xff] }
  0xb7   :  { %v270_v28 = vadd.f32 %v269_v25, %v268_v20  ;;  %v2317_v23 = vld [vmem:[#allocation5 + $0x88] sm:$0xff]  ;;  %580 = vmatpush.bf16.msra.mxu3 %v2301_v21  ;;  %v2330_v21 = vld [vmem:[#allocation5 + $0xf0] sm:$0xff] }
  0xb8   :  { %v273_v29 = vrot.slane %v259_v26, 4  ;;  %v265_v30 = vrot.slane %v264_v27, 1 }
  0xb9   :  { %v271_v31 = vrot.slane %v270_v28, 1 }
  0xba   :  { %v274_v32 = vadd.f32 %v273_v29, %v259_v26  ;;  %v266_v37 = vadd.f32 %v265_v30, %v264_v27  ;;  %v2308_v29 = vld [vmem:[#allocation5 + $0x40] sm:$0xff] }
  0xbb   :  { %v252_v36 = vpop.f32.mrf.mxu2  ;;  %v272_v38 = vadd.f32 %v271_v31, %v270_v28  ;;  %v2300_v28 = vld [vmem:[#allocation5] sm:$0xff]  ;;  %594 = vmatpush.bf16.msrb.mxu0 %v2308_v29 }
  0xbc   :  { %v275_v39 = vrot.slane %v274_v32, 2  ;;  %v279_v40 = vmul.f32 0.125, %v266_v37  ;;  %v2316_v30 = vld [vmem:[#allocation5 + $0x80] sm:$0xff]  ;;  %581 = vmatpush.bf16.msra.mxu3 %v2300_v28 }
  0xbd   :  { %v280_v41 = vmul.f32 0.125, %v272_v38 }
  0xbe   :  { %v276_v42 = vadd.f32 %v275_v39, %v274_v32  ;;  %v2562_v46 = vsub.f32 %v257_v14, %v279_v40  ;;  %v2318_v14 = vld [vmem:[#allocation5 + $0x90] sm:$0xff] }
  0xbf   :  { %v2564_v47 = vsub.f32 %v258_v15, %v280_v41  ;;  %605 = vmatpush.bf16.msrb.mxu1 %v2318_v14 }
  0xc0   :  { %v277_v48 = vrot.slane %v276_v42, 1  ;;  %v285_v49 = vmul.f32 %v2562_v46, %v2562_v46 }
  0xc1   :  { %v286_v50 = vmul.f32 %v2564_v47, %v2564_v47 }
  0xc2   :  { %v278_v51 = vadd.f32 %v277_v48, %v276_v42  ;;  %v288_v55 = vrot.slane %v285_v49, 4 }
  0xc3   :  { %v294_v56 = vrot.slane %v286_v50, 4  ;;  %606 = vmatpush.bf16.msrb.mxu1 %v2317_v23 }
  0xc4   :  { %v281_v57 = vmul.f32 0.125, %v278_v51  ;;  %v289_v58 = vadd.f32 %v288_v55, %v285_v49 }
  0xc5   :  { %v295_v59 = vadd.f32 %v294_v56, %v286_v50  ;;  %v260_v56 = vld [vmem:[%s2618_s2] sm:$0x3f] }
  0xc6   :  { %v2570_v60 = vsub.f32 %v259_v26, %v281_v57  ;;  %v290_v0 = vrot.slane %v289_v58, 2  ;;  %v367_v62 = vperm.slane %v260_v56, 1  ;;  %v368_v63 = vperm.slane %v260_v56, 3 }
  0xc7   :  { %v296_v1 = vrot.slane %v295_v59, 2  ;;  %607 = vmatpush.bf16.msrb.mxu1 %v2316_v30 }
  0xc8   :  { %v287_v2 = vmul.f32 %v2570_v60, %v2570_v60  ;;  %v291_v6 = vadd.f32 %v290_v0, %v289_v58  ;;  %v373_v5 = vperm.slane %v367_v62, 1 }
  0xc9   :  { %v297_v7 = vadd.f32 %v296_v1, %v295_v59  ;;  %v369_v1 = vperm.slane %v260_v56, 5 }
  0xca   :  { %v300_v8 = vrot.slane %v287_v2, 4  ;;  %v292_v9 = vrot.slane %v291_v6, 1 }
  0xcb   :  { %v298_v10 = vrot.slane %v297_v7, 1 }
  0xcc   :  { %v301_v11 = vadd.f32 %v300_v8, %v287_v2  ;;  %v293_v15 = vadd.f32 %v292_v9, %v291_v6  ;;  %v374_v6 = vperm.slane %v368_v63, 1 }
  0xcd   :  { %v299_v16 = vadd.f32 %v298_v10, %v297_v7  ;;  %v375_v10 = vperm.slane %v369_v1, 1 }
  0xce   :  { %v302_v17 = vrot.slane %v301_v11, 2  ;;  %v306_v18 = vmul.f32 0.125, %v293_v15 }
  0xcf   :  { %v307_v19 = vmul.f32 0.125, %v299_v16 }
  0xd0   :  { %v303_v20 = vadd.f32 %v302_v17, %v301_v11  ;;  %v309_v24 = vadd.f32 1e-05, %v306_v18 }
  0xd1   :  { %v310_v25 = vadd.f32 1e-05, %v307_v19 }
  0xd2   :  { %v304_v26 = vrot.slane %v303_v20, 1  ;;  %2412 = vrsqrt.f32 %v309_v24  ;;  %vm318_vm6 = vweird.f32 %v309_v24 }
  0xd3   :  { %2414 = vrsqrt.f32 %v310_v25  ;;  %vm328_vm1 = vweird.f32 %v310_v25 }
  0xd4   :  { %v305_v27 = vadd.f32 %v304_v26, %v303_v20  ;;  %v2331_v20 = vld [vmem:[#allocation5 + $0xf8] sm:$0xff]  ;;  %v2326_v26 = vld [vmem:[#allocation5 + $0xd0] sm:$0xff] }
  0xd5   :  { %713 = vmatpush.bf16.msrb.mxu2 %v2331_v20  ;;  %v2335_v20 = vld [vmem:[#allocation5 + $0x118] sm:$0xff] }
  0xd6   :  { %v308_v31 = vmul.f32 0.125, %v305_v27 }
  0xd8   :  { %v311_v32 = vadd.f32 1e-05, %v308_v31  ;;  %v2413_v33 = vpop.eup %2412  ;;  %v2325_v31 = vld [vmem:[#allocation5 + $0xc8] sm:$0xff] }
  0xd9   :  { %v2415_v34 = vpop.eup %2414  ;;  %v313_v35 = vmul.f32 %v2413_v33, %v309_v24  ;;  %vm319_vm4 = vweird.f32 %v2413_v33  ;;  %714 = vmatpush.bf16.msrb.mxu2 %v2330_v21 }
  0xda   :  { %2416 = vrsqrt.f32 %v311_v32  ;;  %v323_v36 = vmul.f32 %v2415_v34, %v310_v25  ;;  %vm329_vm0 = vweird.f32 %v2415_v34  ;;  %vm338_vm5 = vweird.f32 %v311_v32  ;;  %vm320_vm9 = vmor %vm318_vm6, %vm319_vm4 }
  0xdb   :  { %v314_v37 = vmul.f32 %v2413_v33, %v313_v35  ;;  %vm330_vm2 = vmor %vm328_vm1, %vm329_vm0  ;;  %v2324_v35 = vld [vmem:[#allocation5 + $0xc0] sm:$0xff] }
  0xdc   :  { %v324_v38 = vmul.f32 %v2415_v34, %v323_v36 }
  0xdd   :  { %v315_v41 = vmul.f32 0.5, %v314_v37  ;;  %715 = vmatpush.bf16.msrb.mxu2 %v2329_v22 }
  0xde   :  { %v325_v39 = vmul.f32 0.5, %v324_v38 }
  0xdf   :  { %v316_v48 = vsub.f32 1.5, %v315_v41 }
  0xe0   :  { %v2417_v40 = vpop.eup %2416  ;;  %v326_v42 = vsub.f32 1.5, %v325_v39 }
  0xe1   :  { %v333_v43 = vmul.f32 %v2417_v40, %v311_v32  ;;  %vm339_vm3 = vweird.f32 %v2417_v40  ;;  %v317_v52 = vmul.f32 %v2413_v33, %v316_v48 }
  0xe2   :  { %v327_v45 = vmul.f32 %v2415_v34, %v326_v42  ;;  %vm340_vm7 = vmor %vm338_vm5, %vm339_vm3 }
  0xe3   :  { %v334_v44 = vmul.f32 %v2417_v40, %v333_v43  ;;  %v321_v57 = vsel %vm320_vm9, %v2413_v33, %v317_v52 }
  0xe4   :  { %v331_v50 = vsel %vm330_vm2, %v2415_v34, %v327_v45 }
  0xe5   :  { %v335_v49 = vmul.f32 0.5, %v334_v44  ;;  %v345_v54 = vrot.slane %v331_v50, 6 }
  0xe7   :  { %v336_v51 = vsub.f32 1.5, %v335_v49  ;;  %v348_v59 = vsel %vm347_vm8, %v321_v57, %v345_v54 }
  0xe9   :  { %v337_v53 = vmul.f32 %v2417_v40, %v336_v51 }
  0xeb   :  { %v341_v55 = vsel %vm340_vm7, %v2417_v40, %v337_v53 }
  0xec   :  { %v346_v58 = vrot.slane %v341_v55, 4 }
  0xee   :  { %v350_v61 = vsel %vm349_vm10, %v348_v59, %v346_v58  ;;  %v615_v59 = vld [vmem:[%s2620_s4] sm:$0x3] }
  0xef   :  { %v352_v0 = vmul.f32 %v350_v61, %v260_v56  ;;  %v646_v1 = vperm.slane %v615_v59, 1 }
  0xf1   :  { %v354_v2 = vperm.slane %v352_v0, 0  ;;  %v355_v3 = vperm.slane %v352_v0, 2  ;;  %v356_v4 = vperm.slane %v352_v0, 4 }
  0xf3   :  { %v360_v7 = vperm.slane %v354_v2, 0  ;;  %v361_v8 = vperm.slane %v355_v3, 0  ;;  %v362_v9 = vperm.slane %v356_v4, 0 }
  0xf5   :  { %v363_v11 = vmul.f32 %v360_v7, %v2562_v46  ;;  %v364_v12 = vmul.f32 %v361_v8, %v2564_v47  ;;  %v365_v13 = vmul.f32 %v362_v9, %v2570_v60  ;;  %v2328_v46 = vld [vmem:[#allocation5 + $0xe0] sm:$0xff]  ;;  %v2327_v60 = vld [vmem:[#allocation5 + $0xd8] sm:$0xff] }
  0xf6   :  { %716 = vmatpush.bf16.msrb.mxu2 %v2328_v46  ;;  %v2339_v8 = vld [vmem:[#allocation5 + $0x138] sm:$0xff]  ;;  %v2334_v46 = vld [vmem:[#allocation5 + $0x110] sm:$0xff] }
  0xf7   :  { %v376_v14 = vadd.f32 %v373_v5, %v363_v11  ;;  %v377_v15 = vadd.f32 %v374_v6, %v364_v12  ;;  %v378_v16 = vadd.f32 %v375_v10, %v365_v13  ;;  %826 = vmatpush.bf16.msrb.mxu3 %v2339_v8  ;;  %v2338_v11 = vld [vmem:[#allocation5 + $0x130] sm:$0xff]  ;;  %v2340_v8 = vld [vmem:[#allocation5 + $0x140] sm:$0xff] }
  0xf9   :  { %v427_v17 = vpack.c.bf16 %v376_v14, %v376_v14  ;;  %v428_v18 = vpack.c.bf16 %v377_v15, %v377_v15  ;;  %v429_v19 = vpack.c.bf16 %v378_v16, %v378_v16  ;;  %v2337_v14 = vld [vmem:[#allocation5 + $0x128] sm:$0xff] }
  0xfa   :  { %717 = vmatpush.bf16.msrb.mxu2 %v2327_v60  ;;  %v2333_v60 = vld [vmem:[#allocation5 + $0x108] sm:$0xff] }
  0xfb   :  { %582 = vmatmul.bf16.vlgmr.msra.gmra.mxu3 %v427_v17  ;;  %595 = vmatmul.bf16.vlgmr.msrb.gmra.mxu0 %v428_v18  ;;  %v2336_v17 = vld [vmem:[#allocation5 + $0x120] sm:$0xff] }
  0xfc   :  { %608 = vmatmul.bf16.vlgmr.msrb.gmra.mxu1 %v429_v19  ;;  %827 = vmatpush.bf16.msrb.mxu3 %v2338_v11 }
  0xfe   :  { %718 = vmatpush.bf16.msrb.mxu2 %v2326_v26  ;;  %v2332_v26 = vld [vmem:[#allocation5 + $0x100] sm:$0xff] }
 0x100   :  { %828 = vmatpush.bf16.msrb.mxu3 %v2337_v14 }
 0x102   :  { %719 = vmatpush.bf16.msrb.mxu2 %v2325_v31 }
 0x104   :  { %829 = vmatpush.bf16.msrb.mxu3 %v2336_v17 }
 0x106   :  { %720 = vmatpush.bf16.msrb.mxu2 %v2324_v35 }
 0x108   :  { %830 = vmatpush.bf16.msrb.mxu3 %v2335_v20 }
 0x10c   :  { %831 = vmatpush.bf16.msrb.mxu3 %v2334_v46 }
 0x110   :  { %832 = vmatpush.bf16.msrb.mxu3 %v2333_v60 }
 0x114   :  { %833 = vmatpush.bf16.msrb.mxu3 %v2332_v26 }
 0x178   :  { %v596_v23 = vpop.f32.mrf.mxu0 }
 0x179   :  { %v609_v47 = vpop.f32.mrf.mxu1 }
 0x17e   :  { %v583_v24 = vpop.f32.mrf.mxu3 }
 0x17f   :  { %v597_v25 = vadd.f32 %v596_v23, %v583_v24 }
 0x180   :  { %v598_v27 = vpop.f32.mrf.mxu0 }
 0x181   :  { %v610_v28 = vadd.f32 %v609_v47, %v597_v25  ;;  %v611_v29 = vpop.f32.mrf.mxu1 }
 0x183   :  { %v613_v30 = vmul.f32 0.01, %v610_v28 }
 0x185   :  { %v614_v32 = vmax.f32 %v610_v28, %v613_v30 }
 0x186   :  { %v585_v33 = vpop.f32.mrf.mxu3 }
 0x187   :  { %v616_v34 = vrot.slane %v614_v32, 4 }
 0x189   :  { %v617_v36 = vadd.f32 %v616_v34, %v614_v32 }
 0x18b   :  { %v618_v37 = vrot.slane %v617_v36, 2 }
 0x18d   :  { %v619_v38 = vadd.f32 %v618_v37, %v617_v36  ;;  %v728_v36 = vld [vmem:[%s2620_s4 + $0x2] sm:$0x3] }
 0x18f   :  { %v620_v39 = vrot.slane %v619_v38, 1 }
 0x191   :  { %v621_v40 = vadd.f32 %v620_v39, %v619_v38 }
 0x193   :  { %v622_v41 = vmul.f32 0.125, %v621_v40 }
 0x195   :  { %v623_v42 = vsub.f32 %v614_v32, %v622_v41  ;;  %v759_v41 = vperm.slane %v728_v36, 1 }
 0x197   :  { %v624_v43 = vmul.f32 %v623_v42, %v623_v42 }
 0x199   :  { %v625_v44 = vrot.slane %v624_v43, 4 }
 0x19b   :  { %v626_v45 = vadd.f32 %v625_v44, %v624_v43 }
 0x19d   :  { %v627_v48 = vrot.slane %v626_v45, 2 }
 0x19f   :  { %v628_v49 = vadd.f32 %v627_v48, %v626_v45 }
 0x1a1   :  { %v629_v50 = vrot.slane %v628_v49, 1 }
 0x1a3   :  { %v630_v51 = vadd.f32 %v629_v50, %v628_v49  ;;  %v2347_v50 = vld [vmem:[#allocation5 + $0x178] sm:$0xff] }
 0x1a4   :  { %939 = vmatpush.bf16.msra.mxu0 %v2347_v50  ;;  %v2348_v50 = vld [vmem:[#allocation5 + $0x180] sm:$0xff] }
 0x1a5   :  { %v631_v52 = vmul.f32 0.125, %v630_v51 }
 0x1a7   :  { %v632_v53 = vadd.f32 1e-05, %v631_v52 }
 0x1a9   :  { %2418 = vrsqrt.f32 %v632_v53  ;;  %vm639_vm12 = vweird.f32 %v632_v53 }
 0x1af   :  { %v2419_v54 = vpop.eup %2418 }
 0x1b0   :  { %v634_v55 = vmul.f32 %v2419_v54, %v632_v53  ;;  %vm640_vm11 = vweird.f32 %v2419_v54  ;;  %v2346_v53 = vld [vmem:[#allocation5 + $0x170] sm:$0xff] }
 0x1b1   :  { %vm641_vm13 = vmor %vm639_vm12, %vm640_vm11  ;;  %940 = vmatpush.bf16.msra.mxu0 %v2346_v53 }
 0x1b2   :  { %v635_v56 = vmul.f32 %v2419_v54, %v634_v55 }
 0x1b4   :  { %v636_v57 = vmul.f32 0.5, %v635_v56 }
 0x1b6   :  { %v637_v58 = vsub.f32 1.5, %v636_v57  ;;  %v2345_v57 = vld [vmem:[#allocation5 + $0x168] sm:$0xff] }
 0x1b7   :  { %941 = vmatpush.bf16.msra.mxu0 %v2345_v57 }
 0x1b8   :  { %v638_v61 = vmul.f32 %v2419_v54, %v637_v58 }
 0x1ba   :  { %v642_v62 = vsel %vm641_vm13, %v2419_v54, %v638_v61  ;;  %v2344_v61 = vld [vmem:[#allocation5 + $0x160] sm:$0xff] }
 0x1bb   :  { %v643_v63 = vmul.f32 %v642_v62, %v615_v59  ;;  %942 = vmatpush.bf16.msra.mxu0 %v2344_v61  ;;  %v954_v61 = vld [vmem:[%s2620_s4 + $0x6] sm:$0x3] }
 0x1bd   :  { %v644_v0 = vperm.slane %v643_v63, 0 }
 0x1bf   :  { %v645_v2 = vmul.f32 %v644_v0, %v623_v42  ;;  %v2343_v0 = vld [vmem:[#allocation5 + $0x158] sm:$0xff] }
 0x1c0   :  { %943 = vmatpush.bf16.msra.mxu0 %v2343_v0 }
 0x1c1   :  { %v647_v3 = vadd.f32 %v646_v1, %v645_v2 }
 0x1c3   :  { %v664_v4 = vpack.c.bf16 %v647_v3, %v647_v3  ;;  %v2342_v3 = vld [vmem:[#allocation5 + $0x150] sm:$0xff] }
 0x1c4   :  { %944 = vmatpush.bf16.msra.mxu0 %v2342_v3 }
 0x1c5   :  { %721 = vmatmul.bf16.vlgmr.msrb.gmra.mxu2 %v664_v4 }
 0x248   :  { %v722_v5 = vpop.f32.mrf.mxu2 }
 0x249   :  { %v726_v6 = vmul.f32 0.01, %v722_v5 }
 0x24b   :  { %v727_v7 = vmax.f32 %v722_v5, %v726_v6  ;;  %v2341_v6 = vld [vmem:[#allocation5 + $0x148] sm:$0xff] }
 0x24c   :  { %945 = vmatpush.bf16.msra.mxu0 %v2341_v6 }
 0x24d   :  { %v729_v9 = vrot.slane %v727_v7, 4 }
 0x24f   :  { %v730_v10 = vadd.f32 %v729_v9, %v727_v7 }
 0x250   :  { %v724_v12 = vpop.f32.mrf.mxu2  ;;  %946 = vmatpush.bf16.msra.mxu0 %v2340_v8 }
 0x251   :  { %v731_v13 = vrot.slane %v730_v10, 2 }
 0x253   :  { %v732_v15 = vadd.f32 %v731_v13, %v730_v10 }
 0x255   :  { %v733_v16 = vrot.slane %v732_v15, 1 }
 0x257   :  { %v734_v18 = vadd.f32 %v733_v16, %v732_v15 }
 0x259   :  { %v735_v19 = vmul.f32 0.125, %v734_v18  ;;  %v841_v18 = vld [vmem:[%s2620_s4 + $0x4] sm:$0x3] }
 0x25a   :  { %v872_v46 = vperm.slane %v841_v18, 1 }
 0x25b   :  { %v736_v21 = vsub.f32 %v727_v7, %v735_v19 }
 0x25d   :  { %v737_v22 = vmul.f32 %v736_v21, %v736_v21 }
 0x25f   :  { %v738_v23 = vrot.slane %v737_v22, 4 }
 0x261   :  { %v739_v47 = vadd.f32 %v738_v23, %v737_v22 }
 0x263   :  { %v740_v24 = vrot.slane %v739_v47, 2 }
 0x265   :  { %v741_v25 = vadd.f32 %v740_v24, %v739_v47 }
 0x267   :  { %v742_v27 = vrot.slane %v741_v25, 1 }
 0x269   :  { %v743_v28 = vadd.f32 %v742_v27, %v741_v25  ;;  %v2355_v27 = vld [vmem:[#allocation5 + $0x1b8] sm:$0xff] }
 0x26a   :  { %1052 = vmatpush.bf16.msra.mxu1 %v2355_v27  ;;  %v2356_v27 = vld [vmem:[#allocation5 + $0x1c0] sm:$0xff] }
 0x26b   :  { %v744_v29 = vmul.f32 0.125, %v743_v28 }
 0x26d   :  { %v745_v30 = vadd.f32 1e-05, %v744_v29 }
 0x26f   :  { %2420 = vrsqrt.f32 %v745_v30  ;;  %vm752_vm15 = vweird.f32 %v745_v30 }
 0x275   :  { %v2421_v31 = vpop.eup %2420 }
 0x276   :  { %v747_v32 = vmul.f32 %v2421_v31, %v745_v30  ;;  %vm753_vm14 = vweird.f32 %v2421_v31  ;;  %v2354_v30 = vld [vmem:[#allocation5 + $0x1b0] sm:$0xff] }
 0x277   :  { %vm754_vm0 = vmor %vm752_vm15, %vm753_vm14  ;;  %1053 = vmatpush.bf16.msra.mxu1 %v2354_v30 }
 0x278   :  { %v748_v33 = vmul.f32 %v2421_v31, %v747_v32 }
 0x27a   :  { %v749_v34 = vmul.f32 0.5, %v748_v33 }
 0x27c   :  { %v750_v35 = vsub.f32 1.5, %v749_v34  ;;  %v2353_v34 = vld [vmem:[#allocation5 + $0x1a8] sm:$0xff] }
 0x27d   :  { %1054 = vmatpush.bf16.msra.mxu1 %v2353_v34 }
 0x27e   :  { %v751_v37 = vmul.f32 %v2421_v31, %v750_v35 }
 0x280   :  { %v755_v38 = vsel %vm754_vm0, %v2421_v31, %v751_v37  ;;  %v2352_v37 = vld [vmem:[#allocation5 + $0x1a0] sm:$0xff] }
 0x281   :  { %v756_v39 = vmul.f32 %v755_v38, %v728_v36  ;;  %1055 = vmatpush.bf16.msra.mxu1 %v2352_v37  ;;  %v1067_v37 = vld [vmem:[%s2620_s4 + $0x8] sm:$0x3] }
 0x283   :  { %v757_v40 = vperm.slane %v756_v39, 0 }
 0x285   :  { %v758_v42 = vmul.f32 %v757_v40, %v736_v21  ;;  %v2351_v40 = vld [vmem:[#allocation5 + $0x198] sm:$0xff] }
 0x286   :  { %1056 = vmatpush.bf16.msra.mxu1 %v2351_v40 }
 0x287   :  { %v760_v43 = vadd.f32 %v759_v41, %v758_v42 }
 0x289   :  { %v777_v44 = vpack.c.bf16 %v760_v43, %v760_v43  ;;  %v2350_v43 = vld [vmem:[#allocation5 + $0x190] sm:$0xff] }
 0x28a   :  { %1057 = vmatpush.bf16.msra.mxu1 %v2350_v43 }
 0x28b   :  { %834 = vmatmul.bf16.vlgmr.msrb.gmra.mxu3 %v777_v44 }
 0x30e   :  { %v835_v45 = vpop.f32.mrf.mxu3 }
 0x30f   :  { %v839_v48 = vmul.f32 0.01, %v835_v45 }
 0x311   :  { %v840_v49 = vmax.f32 %v835_v45, %v839_v48  ;;  %v2349_v48 = vld [vmem:[#allocation5 + $0x188] sm:$0xff] }
 0x312   :  { %1058 = vmatpush.bf16.msra.mxu1 %v2349_v48 }
 0x313   :  { %v842_v51 = vrot.slane %v840_v49, 4 }
 0x315   :  { %v843_v52 = vadd.f32 %v842_v51, %v840_v49 }
 0x316   :  { %v837_v54 = vpop.f32.mrf.mxu3  ;;  %1059 = vmatpush.bf16.msra.mxu1 %v2348_v50 }
 0x317   :  { %v844_v55 = vrot.slane %v843_v52, 2 }
 0x319   :  { %v845_v56 = vadd.f32 %v844_v55, %v843_v52 }
 0x31b   :  { %v846_v58 = vrot.slane %v845_v56, 1 }
 0x31d   :  { %v847_v59 = vadd.f32 %v846_v58, %v845_v56 }
 0x31f   :  { %v848_v62 = vmul.f32 0.125, %v847_v59 }
 0x321   :  { %v849_v63 = vsub.f32 %v840_v49, %v848_v62 }
 0x323   :  { %v850_v1 = vmul.f32 %v849_v63, %v849_v63 }
 0x325   :  { %v851_v2 = vrot.slane %v850_v1, 4 }
 0x327   :  { %v852_v4 = vadd.f32 %v851_v2, %v850_v1  ;;  %v985_v2 = vperm.slane %v954_v61, 1 }
 0x329   :  { %v853_v5 = vrot.slane %v852_v4, 2 }
 0x32b   :  { %v854_v7 = vadd.f32 %v853_v5, %v852_v4 }
 0x32d   :  { %v855_v9 = vrot.slane %v854_v7, 1 }
 0x32f   :  { %v856_v10 = vadd.f32 %v855_v9, %v854_v7  ;;  %v2363_v9 = vld [vmem:[#allocation5 + $0x1f8] sm:$0xff] }
 0x330   :  { %1165 = vmatpush.bf16.msra.mxu2 %v2363_v9  ;;  %v2364_v9 = vld [vmem:[#allocation5 + $0x200] sm:$0xff] }
 0x331   :  { %v857_v11 = vmul.f32 0.125, %v856_v10 }
 0x333   :  { %v858_v12 = vadd.f32 1e-05, %v857_v11 }
 0x335   :  { %2422 = vrsqrt.f32 %v858_v12  ;;  %vm865_vm2 = vweird.f32 %v858_v12 }
 0x33b   :  { %v2423_v13 = vpop.eup %2422 }
 0x33c   :  { %v860_v14 = vmul.f32 %v2423_v13, %v858_v12  ;;  %vm866_vm1 = vweird.f32 %v2423_v13  ;;  %v2362_v12 = vld [vmem:[#allocation5 + $0x1f0] sm:$0xff] }
 0x33d   :  { %vm867_vm3 = vmor %vm865_vm2, %vm866_vm1  ;;  %1166 = vmatpush.bf16.msra.mxu2 %v2362_v12 }
 0x33e   :  { %v861_v15 = vmul.f32 %v2423_v13, %v860_v14 }
 0x340   :  { %v862_v16 = vmul.f32 0.5, %v861_v15 }
 0x342   :  { %v863_v17 = vsub.f32 1.5, %v862_v16  ;;  %v2361_v16 = vld [vmem:[#allocation5 + $0x1e8] sm:$0xff] }
 0x343   :  { %1167 = vmatpush.bf16.msra.mxu2 %v2361_v16 }
 0x344   :  { %v864_v19 = vmul.f32 %v2423_v13, %v863_v17 }
 0x346   :  { %v868_v20 = vsel %vm867_vm3, %v2423_v13, %v864_v19  ;;  %v2360_v19 = vld [vmem:[#allocation5 + $0x1e0] sm:$0xff] }
 0x347   :  { %v869_v21 = vmul.f32 %v868_v20, %v841_v18  ;;  %1168 = vmatpush.bf16.msra.mxu2 %v2360_v19  ;;  %v1180_v19 = vld [vmem:[%s2620_s4 + $0xa] sm:$0x3] }
 0x349   :  { %v870_v22 = vperm.slane %v869_v21, 0 }
 0x34b   :  { %v871_v23 = vmul.f32 %v870_v22, %v849_v63  ;;  %v2359_v22 = vld [vmem:[#allocation5 + $0x1d8] sm:$0xff] }
 0x34c   :  { %1169 = vmatpush.bf16.msra.mxu2 %v2359_v22 }
 0x34d   :  { %v873_v47 = vadd.f32 %v872_v46, %v871_v23 }
 0x34f   :  { %v890_v60 = vpack.c.bf16 %v873_v47, %v873_v47  ;;  %v2358_v47 = vld [vmem:[#allocation5 + $0x1d0] sm:$0xff] }
 0x350   :  { %1170 = vmatpush.bf16.msra.mxu2 %v2358_v47 }
 0x351   :  { %947 = vmatmul.bf16.vlgmr.msra.gmra.mxu0 %v890_v60 }
 0x3ce   :  { %v948_v24 = vpop.f32.mrf.mxu0 }
 0x3cf   :  { %v952_v25 = vmul.f32 0.01, %v948_v24 }
 0x3d1   :  { %v953_v26 = vmax.f32 %v948_v24, %v952_v25  ;;  %v2357_v25 = vld [vmem:[#allocation5 + $0x1c8] sm:$0xff] }
 0x3d2   :  { %1171 = vmatpush.bf16.msra.mxu2 %v2357_v25 }
 0x3d3   :  { %v955_v28 = vrot.slane %v953_v26, 4 }
 0x3d5   :  { %v956_v29 = vadd.f32 %v955_v28, %v953_v26 }
 0x3d6   :  { %v950_v31 = vpop.f32.mrf.mxu0  ;;  %1172 = vmatpush.bf16.msra.mxu2 %v2356_v27 }
 0x3d7   :  { %v957_v32 = vrot.slane %v956_v29, 2 }
 0x3d9   :  { %v958_v33 = vadd.f32 %v957_v32, %v956_v29 }
 0x3db   :  { %v959_v35 = vrot.slane %v958_v33, 1 }
 0x3dd   :  { %v960_v36 = vadd.f32 %v959_v35, %v958_v33 }
 0x3df   :  { %v961_v38 = vmul.f32 0.125, %v960_v36 }
 0x3e1   :  { %v962_v39 = vsub.f32 %v953_v26, %v961_v38 }
 0x3e3   :  { %v963_v41 = vmul.f32 %v962_v39, %v962_v39 }
 0x3e5   :  { %v964_v42 = vrot.slane %v963_v41, 4 }
 0x3e7   :  { %v965_v44 = vadd.f32 %v964_v42, %v963_v41  ;;  %v1098_v42 = vperm.slane %v1067_v37, 1 }
 0x3e9   :  { %v966_v45 = vrot.slane %v965_v44, 2 }
 0x3eb   :  { %v967_v49 = vadd.f32 %v966_v45, %v965_v44 }
 0x3ed   :  { %v968_v51 = vrot.slane %v967_v49, 1 }
 0x3ef   :  { %v969_v52 = vadd.f32 %v968_v51, %v967_v49  ;;  %v2371_v51 = vld [vmem:[#allocation5 + $0x238] sm:$0xff] }
 0x3f0   :  { %1278 = vmatpush.bf16.msra.mxu3 %v2371_v51  ;;  %v2372_v51 = vld [vmem:[#allocation5 + $0x240] sm:$0xff] }
 0x3f1   :  { %v970_v53 = vmul.f32 0.125, %v969_v52 }
 0x3f3   :  { %v971_v54 = vadd.f32 1e-05, %v970_v53 }
 0x3f5   :  { %2424 = vrsqrt.f32 %v971_v54  ;;  %vm978_vm5 = vweird.f32 %v971_v54 }
 0x3fb   :  { %v2425_v55 = vpop.eup %2424 }
 0x3fc   :  { %v973_v56 = vmul.f32 %v2425_v55, %v971_v54  ;;  %vm979_vm4 = vweird.f32 %v2425_v55  ;;  %v2370_v54 = vld [vmem:[#allocation5 + $0x230] sm:$0xff] }
 0x3fd   :  { %vm980_vm6 = vmor %vm978_vm5, %vm979_vm4  ;;  %1279 = vmatpush.bf16.msra.mxu3 %v2370_v54 }
 0x3fe   :  { %v974_v57 = vmul.f32 %v2425_v55, %v973_v56 }
 0x400   :  { %v975_v58 = vmul.f32 0.5, %v974_v57 }
 0x402   :  { %v976_v59 = vsub.f32 1.5, %v975_v58  ;;  %v2369_v58 = vld [vmem:[#allocation5 + $0x228] sm:$0xff] }
 0x403   :  { %1280 = vmatpush.bf16.msra.mxu3 %v2369_v58 }
 0x404   :  { %v977_v62 = vmul.f32 %v2425_v55, %v976_v59 }
 0x406   :  { %v981_v63 = vsel %vm980_vm6, %v2425_v55, %v977_v62  ;;  %v2368_v62 = vld [vmem:[#allocation5 + $0x220] sm:$0xff] }
 0x407   :  { %v982_v0 = vmul.f32 %v981_v63, %v954_v61  ;;  %1281 = vmatpush.bf16.msra.mxu3 %v2368_v62  ;;  %v1293_v62 = vld [vmem:[%s2620_s4 + $0xc] sm:$0x3] }
 0x409   :  { %v983_v1 = vperm.slane %v982_v0, 0 }
 0x40b   :  { %v984_v3 = vmul.f32 %v983_v1, %v962_v39  ;;  %v2367_v1 = vld [vmem:[#allocation5 + $0x218] sm:$0xff] }
 0x40c   :  { %1282 = vmatpush.bf16.msra.mxu3 %v2367_v1 }
 0x40d   :  { %v986_v4 = vadd.f32 %v985_v2, %v984_v3 }
 0x40f   :  { %v1003_v5 = vpack.c.bf16 %v986_v4, %v986_v4  ;;  %v2366_v4 = vld [vmem:[#allocation5 + $0x210] sm:$0xff] }
 0x410   :  { %1283 = vmatpush.bf16.msra.mxu3 %v2366_v4 }
 0x411   :  { %1060 = vmatmul.bf16.vlgmr.msra.gmra.mxu1 %v1003_v5 }
 0x48e   :  { %v1061_v6 = vpop.f32.mrf.mxu1 }
 0x48f   :  { %v1065_v7 = vmul.f32 0.01, %v1061_v6 }
 0x491   :  { %v1066_v8 = vmax.f32 %v1061_v6, %v1065_v7  ;;  %v2365_v7 = vld [vmem:[#allocation5 + $0x208] sm:$0xff] }
 0x492   :  { %1284 = vmatpush.bf16.msra.mxu3 %v2365_v7 }
 0x493   :  { %v1068_v10 = vrot.slane %v1066_v8, 4 }
 0x495   :  { %v1069_v11 = vadd.f32 %v1068_v10, %v1066_v8 }
 0x496   :  { %v1063_v13 = vpop.f32.mrf.mxu1  ;;  %1285 = vmatpush.bf16.msra.mxu3 %v2364_v9 }
 0x497   :  { %v1070_v14 = vrot.slane %v1069_v11, 2 }
 0x499   :  { %v1071_v15 = vadd.f32 %v1070_v14, %v1069_v11 }
 0x49b   :  { %v1072_v17 = vrot.slane %v1071_v15, 1 }
 0x49d   :  { %v1073_v18 = vadd.f32 %v1072_v17, %v1071_v15 }
 0x49f   :  { %v1074_v20 = vmul.f32 0.125, %v1073_v18 }
 0x4a1   :  { %v1075_v21 = vsub.f32 %v1066_v8, %v1074_v20 }
 0x4a3   :  { %v1076_v46 = vmul.f32 %v1075_v21, %v1075_v21 }
 0x4a5   :  { %v1077_v23 = vrot.slane %v1076_v46, 4 }
 0x4a7   :  { %v1078_v60 = vadd.f32 %v1077_v23, %v1076_v46  ;;  %v1211_v23 = vperm.slane %v1180_v19, 1 }
 0x4a9   :  { %v1079_v24 = vrot.slane %v1078_v60, 2 }
 0x4ab   :  { %v1080_v26 = vadd.f32 %v1079_v24, %v1078_v60 }
 0x4ad   :  { %v1081_v28 = vrot.slane %v1080_v26, 1 }
 0x4af   :  { %v1082_v29 = vadd.f32 %v1081_v28, %v1080_v26  ;;  %v2379_v28 = vld [vmem:[#allocation5 + $0x278] sm:$0xff] }
 0x4b0   :  { %1391 = vmatpush.bf16.msrb.mxu0 %v2379_v28  ;;  %v2380_v28 = vld [vmem:[#allocation5 + $0x280] sm:$0xff] }
 0x4b1   :  { %v1083_v30 = vmul.f32 0.125, %v1082_v29 }
 0x4b3   :  { %v1084_v31 = vadd.f32 1e-05, %v1083_v30 }
 0x4b5   :  { %2426 = vrsqrt.f32 %v1084_v31  ;;  %vm1091_vm8 = vweird.f32 %v1084_v31 }
 0x4bb   :  { %v2427_v32 = vpop.eup %2426 }
 0x4bc   :  { %v1086_v33 = vmul.f32 %v2427_v32, %v1084_v31  ;;  %vm1092_vm7 = vweird.f32 %v2427_v32  ;;  %v2378_v31 = vld [vmem:[#allocation5 + $0x270] sm:$0xff] }
 0x4bd   :  { %vm1093_vm9 = vmor %vm1091_vm8, %vm1092_vm7  ;;  %1392 = vmatpush.bf16.msrb.mxu0 %v2378_v31 }
 0x4be   :  { %v1087_v34 = vmul.f32 %v2427_v32, %v1086_v33 }
 0x4c0   :  { %v1088_v35 = vmul.f32 0.5, %v1087_v34 }
 0x4c2   :  { %v1089_v36 = vsub.f32 1.5, %v1088_v35  ;;  %v2377_v35 = vld [vmem:[#allocation5 + $0x268] sm:$0xff] }
 0x4c3   :  { %1393 = vmatpush.bf16.msrb.mxu0 %v2377_v35 }
 0x4c4   :  { %v1090_v38 = vmul.f32 %v2427_v32, %v1089_v36 }
 0x4c6   :  { %v1094_v39 = vsel %vm1093_vm9, %v2427_v32, %v1090_v38  ;;  %v2376_v38 = vld [vmem:[#allocation5 + $0x260] sm:$0xff] }
 0x4c7   :  { %v1095_v40 = vmul.f32 %v1094_v39, %v1067_v37  ;;  %1394 = vmatpush.bf16.msrb.mxu0 %v2376_v38  ;;  %v1406_v38 = vld [vmem:[%s2620_s4 + $0xe] sm:$0x3] }
 0x4c9   :  { %v1096_v41 = vperm.slane %v1095_v40, 0 }
 0x4cb   :  { %v1097_v43 = vmul.f32 %v1096_v41, %v1075_v21  ;;  %v2375_v41 = vld [vmem:[#allocation5 + $0x258] sm:$0xff] }
 0x4cc   :  { %1395 = vmatpush.bf16.msrb.mxu0 %v2375_v41 }
 0x4cd   :  { %v1099_v44 = vadd.f32 %v1098_v42, %v1097_v43 }
 0x4cf   :  { %v1116_v45 = vpack.c.bf16 %v1099_v44, %v1099_v44  ;;  %v2374_v44 = vld [vmem:[#allocation5 + $0x250] sm:$0xff] }
 0x4d0   :  { %1396 = vmatpush.bf16.msrb.mxu0 %v2374_v44 }
 0x4d1   :  { %1173 = vmatmul.bf16.vlgmr.msra.gmra.mxu2 %v1116_v45 }
 0x554   :  { %v1174_v48 = vpop.f32.mrf.mxu2 }
 0x555   :  { %v1178_v49 = vmul.f32 0.01, %v1174_v48 }
 0x557   :  { %v1179_v50 = vmax.f32 %v1174_v48, %v1178_v49  ;;  %v2373_v49 = vld [vmem:[#allocation5 + $0x248] sm:$0xff] }
 0x558   :  { %1397 = vmatpush.bf16.msrb.mxu0 %v2373_v49 }
 0x559   :  { %v1181_v52 = vrot.slane %v1179_v50, 4 }
 0x55b   :  { %v1182_v53 = vadd.f32 %v1181_v52, %v1179_v50 }
 0x55c   :  { %v1176_v55 = vpop.f32.mrf.mxu2  ;;  %1398 = vmatpush.bf16.msrb.mxu0 %v2372_v51 }
 0x55d   :  { %v1183_v56 = vrot.slane %v1182_v53, 2 }
 0x55f   :  { %v1184_v57 = vadd.f32 %v1183_v56, %v1182_v53 }
 0x561   :  { %v1185_v59 = vrot.slane %v1184_v57, 1 }
 0x563   :  { %v1186_v61 = vadd.f32 %v1185_v59, %v1184_v57 }
 0x565   :  { %v1187_v63 = vmul.f32 0.125, %v1186_v61 }
 0x567   :  { %v1188_v0 = vsub.f32 %v1179_v50, %v1187_v63 }
 0x569   :  { %v1189_v2 = vmul.f32 %v1188_v0, %v1188_v0 }
 0x56b   :  { %v1190_v3 = vrot.slane %v1189_v2, 4 }
 0x56d   :  { %v1191_v5 = vadd.f32 %v1190_v3, %v1189_v2  ;;  %v1324_v3 = vperm.slane %v1293_v62, 1 }
 0x56f   :  { %v1192_v6 = vrot.slane %v1191_v5, 2 }
 0x571   :  { %v1193_v8 = vadd.f32 %v1192_v6, %v1191_v5 }
 0x573   :  { %v1194_v10 = vrot.slane %v1193_v8, 1 }
 0x575   :  { %v1195_v11 = vadd.f32 %v1194_v10, %v1193_v8  ;;  %v2387_v10 = vld [vmem:[#allocation5 + $0x2b8] sm:$0xff] }
 0x576   :  { %1504 = vmatpush.bf16.msrb.mxu1 %v2387_v10  ;;  %v2388_v10 = vld [vmem:[#allocation5 + $0x2c0] sm:$0xff] }
 0x577   :  { %v1196_v12 = vmul.f32 0.125, %v1195_v11 }
 0x579   :  { %v1197_v13 = vadd.f32 1e-05, %v1196_v12 }
 0x57b   :  { %2428 = vrsqrt.f32 %v1197_v13  ;;  %vm1204_vm11 = vweird.f32 %v1197_v13 }
 0x581   :  { %v2429_v14 = vpop.eup %2428 }
 0x582   :  { %v1199_v15 = vmul.f32 %v2429_v14, %v1197_v13  ;;  %vm1205_vm10 = vweird.f32 %v2429_v14  ;;  %v2386_v13 = vld [vmem:[#allocation5 + $0x2b0] sm:$0xff] }
 0x583   :  { %vm1206_vm12 = vmor %vm1204_vm11, %vm1205_vm10  ;;  %1505 = vmatpush.bf16.msrb.mxu1 %v2386_v13 }
 0x584   :  { %v1200_v16 = vmul.f32 %v2429_v14, %v1199_v15 }
 0x586   :  { %v1201_v17 = vmul.f32 0.5, %v1200_v16 }
 0x588   :  { %v1202_v18 = vsub.f32 1.5, %v1201_v17  ;;  %v2385_v17 = vld [vmem:[#allocation5 + $0x2a8] sm:$0xff] }
 0x589   :  { %1506 = vmatpush.bf16.msrb.mxu1 %v2385_v17 }
 0x58a   :  { %v1203_v20 = vmul.f32 %v2429_v14, %v1202_v18 }
 0x58c   :  { %v1207_v21 = vsel %vm1206_vm12, %v2429_v14, %v1203_v20  ;;  %v2384_v20 = vld [vmem:[#allocation5 + $0x2a0] sm:$0xff] }
 0x58d   :  { %v1208_v22 = vmul.f32 %v1207_v21, %v1180_v19  ;;  %1507 = vmatpush.bf16.msrb.mxu1 %v2384_v20  ;;  %v1519_v20 = vld [vmem:[%s2620_s4 + $0x10] sm:$0x3] }
 0x58f   :  { %v1209_v46 = vperm.slane %v1208_v22, 0 }
 0x591   :  { %v1210_v47 = vmul.f32 %v1209_v46, %v1188_v0  ;;  %v2383_v46 = vld [vmem:[#allocation5 + $0x298] sm:$0xff] }
 0x592   :  { %1508 = vmatpush.bf16.msrb.mxu1 %v2383_v46 }
 0x593   :  { %v1212_v60 = vadd.f32 %v1211_v23, %v1210_v47 }
 0x595   :  { %v1229_v24 = vpack.c.bf16 %v1212_v60, %v1212_v60  ;;  %v2382_v60 = vld [vmem:[#allocation5 + $0x290] sm:$0xff] }
 0x596   :  { %1509 = vmatpush.bf16.msrb.mxu1 %v2382_v60 }
 0x597   :  { %1286 = vmatmul.bf16.vlgmr.msra.gmra.mxu3 %v1229_v24 }
 0x61a   :  { %v1287_v25 = vpop.f32.mrf.mxu3 }
 0x61b   :  { %v1291_v26 = vmul.f32 0.01, %v1287_v25 }
 0x61d   :  { %v1292_v27 = vmax.f32 %v1287_v25, %v1291_v26  ;;  %v2381_v26 = vld [vmem:[#allocation5 + $0x288] sm:$0xff] }
 0x61e   :  { %1510 = vmatpush.bf16.msrb.mxu1 %v2381_v26 }
 0x61f   :  { %v1294_v29 = vrot.slane %v1292_v27, 4 }
 0x621   :  { %v1295_v30 = vadd.f32 %v1294_v29, %v1292_v27 }
 0x622   :  { %v1289_v32 = vpop.f32.mrf.mxu3  ;;  %1511 = vmatpush.bf16.msrb.mxu1 %v2380_v28 }
 0x623   :  { %v1296_v33 = vrot.slane %v1295_v30, 2 }
 0x625   :  { %v1297_v34 = vadd.f32 %v1296_v33, %v1295_v30 }
 0x627   :  { %v1298_v36 = vrot.slane %v1297_v34, 1 }
 0x629   :  { %v1299_v37 = vadd.f32 %v1298_v36, %v1297_v34 }
 0x62b   :  { %v1300_v39 = vmul.f32 0.125, %v1299_v37 }
 0x62d   :  { %v1301_v40 = vsub.f32 %v1292_v27, %v1300_v39 }
 0x62f   :  { %v1302_v42 = vmul.f32 %v1301_v40, %v1301_v40 }
 0x631   :  { %v1303_v43 = vrot.slane %v1302_v42, 4 }
 0x633   :  { %v1304_v45 = vadd.f32 %v1303_v43, %v1302_v42  ;;  %v1437_v43 = vperm.slane %v1406_v38, 1 }
 0x635   :  { %v1305_v48 = vrot.slane %v1304_v45, 2 }
 0x637   :  { %v1306_v50 = vadd.f32 %v1305_v48, %v1304_v45 }
 0x639   :  { %v1307_v52 = vrot.slane %v1306_v50, 1 }
 0x63b   :  { %v1308_v53 = vadd.f32 %v1307_v52, %v1306_v50  ;;  %v2395_v52 = vld [vmem:[#allocation5 + $0x2f8] sm:$0xff] }
 0x63c   :  { %1617 = vmatpush.bf16.msrb.mxu2 %v2395_v52  ;;  %v2396_v52 = vld [vmem:[#allocation5 + $0x300] sm:$0xff] }
 0x63d   :  { %v1309_v54 = vmul.f32 0.125, %v1308_v53 }
 0x63f   :  { %v1310_v55 = vadd.f32 1e-05, %v1309_v54 }
 0x641   :  { %2430 = vrsqrt.f32 %v1310_v55  ;;  %vm1317_vm14 = vweird.f32 %v1310_v55 }
 0x647   :  { %v2431_v56 = vpop.eup %2430 }
 0x648   :  { %v1312_v57 = vmul.f32 %v2431_v56, %v1310_v55  ;;  %vm1318_vm13 = vweird.f32 %v2431_v56  ;;  %v2394_v55 = vld [vmem:[#allocation5 + $0x2f0] sm:$0xff] }
 0x649   :  { %vm1319_vm15 = vmor %vm1317_vm14, %vm1318_vm13  ;;  %1618 = vmatpush.bf16.msrb.mxu2 %v2394_v55 }
 0x64a   :  { %v1313_v58 = vmul.f32 %v2431_v56, %v1312_v57 }
 0x64c   :  { %v1314_v59 = vmul.f32 0.5, %v1313_v58 }
 0x64e   :  { %v1315_v61 = vsub.f32 1.5, %v1314_v59  ;;  %v2393_v59 = vld [vmem:[#allocation5 + $0x2e8] sm:$0xff] }
 0x64f   :  { %1619 = vmatpush.bf16.msrb.mxu2 %v2393_v59 }
 0x650   :  { %v1316_v63 = vmul.f32 %v2431_v56, %v1315_v61 }
 0x652   :  { %v1320_v0 = vsel %vm1319_vm15, %v2431_v56, %v1316_v63  ;;  %v2392_v63 = vld [vmem:[#allocation5 + $0x2e0] sm:$0xff] }
 0x653   :  { %v1321_v1 = vmul.f32 %v1320_v0, %v1293_v62  ;;  %1620 = vmatpush.bf16.msrb.mxu2 %v2392_v63  ;;  %v1632_v63 = vld [vmem:[%s2620_s4 + $0x12] sm:$0x3] }
 0x655   :  { %v1322_v2 = vperm.slane %v1321_v1, 0 }
 0x657   :  { %v1323_v4 = vmul.f32 %v1322_v2, %v1301_v40  ;;  %v2391_v2 = vld [vmem:[#allocation5 + $0x2d8] sm:$0xff] }
 0x658   :  { %1621 = vmatpush.bf16.msrb.mxu2 %v2391_v2 }
 0x659   :  { %v1325_v5 = vadd.f32 %v1324_v3, %v1323_v4 }
 0x65b   :  { %v1342_v6 = vpack.c.bf16 %v1325_v5, %v1325_v5  ;;  %v2390_v5 = vld [vmem:[#allocation5 + $0x2d0] sm:$0xff] }
 0x65c   :  { %1622 = vmatpush.bf16.msrb.mxu2 %v2390_v5 }
 0x65d   :  { %1399 = vmatmul.bf16.vlgmr.msrb.gmra.mxu0 %v1342_v6 }
 0x6da   :  { %v1400_v7 = vpop.f32.mrf.mxu0 }
 0x6db   :  { %v1404_v8 = vmul.f32 0.01, %v1400_v7 }
 0x6dd   :  { %v1405_v9 = vmax.f32 %v1400_v7, %v1404_v8  ;;  %v2389_v8 = vld [vmem:[#allocation5 + $0x2c8] sm:$0xff] }
 0x6de   :  { %1623 = vmatpush.bf16.msrb.mxu2 %v2389_v8  ;;  %v2411_v8 = vld [vmem:[%s2620_s4 + $0x14] ss:$0 sm:$0xff] }
 0x6df   :  { %v1407_v11 = vrot.slane %v1405_v9, 4 }
 0x6e1   :  { %v1408_v12 = vadd.f32 %v1407_v11, %v1405_v9 }
 0x6e2   :  { %v1402_v14 = vpop.f32.mrf.mxu0  ;;  %1624 = vmatpush.bf16.msrb.mxu2 %v2388_v10 }
 0x6e3   :  { %v1409_v15 = vrot.slane %v1408_v12, 2 }
 0x6e5   :  { %v1410_v16 = vadd.f32 %v1409_v15, %v1408_v12 }
 0x6e7   :  { %v1411_v18 = vrot.slane %v1410_v16, 1 }
 0x6e9   :  { %v1412_v19 = vadd.f32 %v1411_v18, %v1410_v16 }
 0x6eb   :  { %v1413_v21 = vmul.f32 0.125, %v1412_v19 }
 0x6ed   :  { %v1414_v22 = vsub.f32 %v1405_v9, %v1413_v21 }
 0x6ef   :  { %v1415_v23 = vmul.f32 %v1414_v22, %v1414_v22 }
 0x6f1   :  { %v1416_v47 = vrot.slane %v1415_v23, 4 }
 0x6f3   :  { %v1417_v24 = vadd.f32 %v1416_v47, %v1415_v23  ;;  %v1550_v47 = vperm.slane %v1519_v20, 1 }
 0x6f5   :  { %v1418_v25 = vrot.slane %v1417_v24, 2 }
 0x6f7   :  { %v1419_v27 = vadd.f32 %v1418_v25, %v1417_v24 }
 0x6f9   :  { %v1420_v29 = vrot.slane %v1419_v27, 1 }
 0x6fb   :  { %v1421_v30 = vadd.f32 %v1420_v29, %v1419_v27  ;;  %v2403_v29 = vld [vmem:[#allocation5 + $0x338] sm:$0xff] }
 0x6fc   :  { %1732 = vmatpush.bf16.msrb.mxu3 %v2403_v29 }
 0x6fd   :  { %v1422_v31 = vmul.f32 0.125, %v1421_v30 }
 0x6ff   :  { %v1423_v32 = vadd.f32 1e-05, %v1422_v31 }
 0x701   :  { %2432 = vrsqrt.f32 %v1423_v32  ;;  %vm1430_vm1 = vweird.f32 %v1423_v32 }
 0x707   :  { %v2433_v33 = vpop.eup %2432 }
 0x708   :  { %v1425_v34 = vmul.f32 %v2433_v33, %v1423_v32  ;;  %vm1431_vm0 = vweird.f32 %v2433_v33  ;;  %v2402_v32 = vld [vmem:[#allocation5 + $0x330] sm:$0xff] }
 0x709   :  { %vm1432_vm2 = vmor %vm1430_vm1, %vm1431_vm0  ;;  %1733 = vmatpush.bf16.msrb.mxu3 %v2402_v32 }
 0x70a   :  { %v1426_v35 = vmul.f32 %v2433_v33, %v1425_v34 }
 0x70c   :  { %v1427_v36 = vmul.f32 0.5, %v1426_v35 }
 0x70e   :  { %v1428_v37 = vsub.f32 1.5, %v1427_v36  ;;  %v2401_v36 = vld [vmem:[#allocation5 + $0x328] sm:$0xff] }
 0x70f   :  { %1734 = vmatpush.bf16.msrb.mxu3 %v2401_v36 }
 0x710   :  { %v1429_v39 = vmul.f32 %v2433_v33, %v1428_v37 }
 0x712   :  { %v1433_v40 = vsel %vm1432_vm2, %v2433_v33, %v1429_v39  ;;  %v2400_v39 = vld [vmem:[#allocation5 + $0x320] sm:$0xff] }
 0x713   :  { %v1434_v41 = vmul.f32 %v1433_v40, %v1406_v38  ;;  %1735 = vmatpush.bf16.msrb.mxu3 %v2400_v39 }
 0x715   :  { %v1435_v42 = vperm.slane %v1434_v41, 0 }
 0x717   :  { %v1436_v44 = vmul.f32 %v1435_v42, %v1414_v22  ;;  %v2399_v42 = vld [vmem:[#allocation5 + $0x318] sm:$0xff] }
 0x718   :  { %1736 = vmatpush.bf16.msrb.mxu3 %v2399_v42 }
 0x719   :  { %v1438_v45 = vadd.f32 %v1437_v43, %v1436_v44 }
 0x71b   :  { %v1455_v48 = vpack.c.bf16 %v1438_v45, %v1438_v45  ;;  %v2398_v45 = vld [vmem:[#allocation5 + $0x310] sm:$0xff] }
 0x71c   :  { %1737 = vmatpush.bf16.msrb.mxu3 %v2398_v45 }
 0x71d   :  { %1512 = vmatmul.bf16.vlgmr.msrb.gmra.mxu1 %v1455_v48 }
 0x79a   :  { %v1513_v49 = vpop.f32.mrf.mxu1 }
 0x79b   :  { %v1517_v50 = vmul.f32 0.01, %v1513_v49 }
 0x79d   :  { %v1518_v51 = vmax.f32 %v1513_v49, %v1517_v50  ;;  %v2397_v50 = vld [vmem:[#allocation5 + $0x308] sm:$0xff] }
 0x79e   :  { %1738 = vmatpush.bf16.msrb.mxu3 %v2397_v50 }
 0x79f   :  { %v1520_v53 = vrot.slane %v1518_v51, 4 }
 0x7a1   :  { %v1521_v54 = vadd.f32 %v1520_v53, %v1518_v51 }
 0x7a2   :  { %v1515_v56 = vpop.f32.mrf.mxu1  ;;  %1739 = vmatpush.bf16.msrb.mxu3 %v2396_v52 }
 0x7a3   :  { %v1522_v57 = vrot.slane %v1521_v54, 2 }
 0x7a5   :  { %v1523_v58 = vadd.f32 %v1522_v57, %v1521_v54 }
 0x7a7   :  { %v1524_v61 = vrot.slane %v1523_v58, 1 }
 0x7a9   :  { %v1525_v62 = vadd.f32 %v1524_v61, %v1523_v58 }
 0x7ab   :  { %v1526_v0 = vmul.f32 0.125, %v1525_v62 }
 0x7ad   :  { %v1527_v1 = vsub.f32 %v1518_v51, %v1526_v0 }
 0x7af   :  { %v1528_v3 = vmul.f32 %v1527_v1, %v1527_v1 }
 0x7b1   :  { %v1529_v4 = vrot.slane %v1528_v3, 4 }
 0x7b3   :  { %v1530_v6 = vadd.f32 %v1529_v4, %v1528_v3  ;;  %v1663_v4 = vperm.slane %v1632_v63, 1 }
 0x7b5   :  { %v1531_v7 = vrot.slane %v1530_v6, 2 }
 0x7b7   :  { %v1532_v9 = vadd.f32 %v1531_v7, %v1530_v6 }
 0x7b9   :  { %v1533_v11 = vrot.slane %v1532_v9, 1 }
 0x7bb   :  { %v1534_v12 = vadd.f32 %v1533_v11, %v1532_v9 }
 0x7bd   :  { %v1535_v13 = vmul.f32 0.125, %v1534_v12 }
 0x7bf   :  { %v1536_v14 = vadd.f32 1e-05, %v1535_v13 }
 0x7c1   :  { %2434 = vrsqrt.f32 %v1536_v14  ;;  %vm1543_vm4 = vweird.f32 %v1536_v14 }
 0x7c7   :  { %v2435_v15 = vpop.eup %2434 }
 0x7c8   :  { %v1538_v16 = vmul.f32 %v2435_v15, %v1536_v14  ;;  %vm1544_vm3 = vweird.f32 %v2435_v15 }
 0x7c9   :  { %vm1545_vm5 = vmor %vm1543_vm4, %vm1544_vm3 }
 0x7ca   :  { %v1539_v17 = vmul.f32 %v2435_v15, %v1538_v16 }
 0x7cc   :  { %v1540_v18 = vmul.f32 0.5, %v1539_v17 }
 0x7ce   :  { %v1541_v19 = vsub.f32 1.5, %v1540_v18 }
 0x7d0   :  { %v1542_v21 = vmul.f32 %v2435_v15, %v1541_v19 }
 0x7d2   :  { %v1546_v22 = vsel %vm1545_vm5, %v2435_v15, %v1542_v21 }
 0x7d3   :  { %v1547_v46 = vmul.f32 %v1546_v22, %v1519_v20 }
 0x7d5   :  { %v1548_v23 = vperm.slane %v1547_v46, 0 }
 0x7d7   :  { %v1549_v60 = vmul.f32 %v1548_v23, %v1527_v1 }
 0x7d9   :  { %v1551_v24 = vadd.f32 %v1550_v47, %v1549_v60 }
 0x7db   :  { %v1568_v25 = vpack.c.bf16 %v1551_v24, %v1551_v24 }
 0x7dd   :  { %1625 = vmatmul.bf16.vlgmr.msrb.gmra.mxu2 %v1568_v25 }
 0x860   :  { %v1626_v26 = vpop.f32.mrf.mxu2 }
 0x861   :  { %v1630_v27 = vmul.f32 0.01, %v1626_v26 }
 0x863   :  { %v1631_v28 = vmax.f32 %v1626_v26, %v1630_v27 }
 0x865   :  { %v1633_v30 = vrot.slane %v1631_v28, 4 }
 0x867   :  { %v1634_v31 = vadd.f32 %v1633_v30, %v1631_v28 }
 0x868   :  { %v1628_v33 = vpop.f32.mrf.mxu2 }
 0x869   :  { %v1635_v34 = vrot.slane %v1634_v31, 2 }
 0x86b   :  { %v1636_v35 = vadd.f32 %v1635_v34, %v1634_v31 }
 0x86d   :  { %v1637_v37 = vrot.slane %v1636_v35, 1 }
 0x86f   :  { %v1638_v38 = vadd.f32 %v1637_v37, %v1636_v35 }
 0x871   :  { %v1639_v40 = vmul.f32 0.125, %v1638_v38 }
 0x873   :  { %v1640_v41 = vsub.f32 %v1631_v28, %v1639_v40 }
 0x875   :  { %v1641_v43 = vmul.f32 %v1640_v41, %v1640_v41 }
 0x877   :  { %v1642_v44 = vrot.slane %v1641_v43, 4 }
 0x879   :  { %v1643_v48 = vadd.f32 %v1642_v44, %v1641_v43 }
 0x87b   :  { %v1644_v49 = vrot.slane %v1643_v48, 2 }
 0x87d   :  { %v1645_v51 = vadd.f32 %v1644_v49, %v1643_v48 }
 0x87f   :  { %v1646_v53 = vrot.slane %v1645_v51, 1 }
 0x881   :  { %v1647_v54 = vadd.f32 %v1646_v53, %v1645_v51 }
 0x883   :  { %v1648_v55 = vmul.f32 0.125, %v1647_v54 }
 0x885   :  { %v1649_v56 = vadd.f32 1e-05, %v1648_v55 }
 0x887   :  { %2436 = vrsqrt.f32 %v1649_v56  ;;  %vm1656_vm7 = vweird.f32 %v1649_v56 }
 0x88d   :  { %v2437_v57 = vpop.eup %2436 }
 0x88e   :  { %v1651_v58 = vmul.f32 %v2437_v57, %v1649_v56  ;;  %vm1657_vm6 = vweird.f32 %v2437_v57 }
 0x88f   :  { %vm1658_vm8 = vmor %vm1656_vm7, %vm1657_vm6 }
 0x890   :  { %v1652_v59 = vmul.f32 %v2437_v57, %v1651_v58 }
 0x892   :  { %v1653_v61 = vmul.f32 0.5, %v1652_v59 }
 0x894   :  { %v1654_v62 = vsub.f32 1.5, %v1653_v61 }
 0x896   :  { %v1655_v0 = vmul.f32 %v2437_v57, %v1654_v62 }
 0x898   :  { %v1659_v1 = vsel %vm1658_vm8, %v2437_v57, %v1655_v0 }
 0x899   :  { %v1660_v2 = vmul.f32 %v1659_v1, %v1632_v63 }
 0x89b   :  { %v1661_v3 = vperm.slane %v1660_v2, 0 }
 0x89d   :  { %v1662_v5 = vmul.f32 %v1661_v3, %v1640_v41 }
 0x89f   :  { %v1664_v6 = vadd.f32 %v1663_v4, %v1662_v5 }
 0x8a1   :  { %v1681_v7 = vpack.c.bf16 %v1664_v6, %v1664_v6 }
 0x8a3   :  { %1740 = vmatmul.bf16.vlgmr.msrb.gmra.mxu3 %v1681_v7 }
 0x926   :  { %v1741_v9 = vpop.f32.mrf.mxu3 }
 0x927   :  { %v1742_v10 = vadd.f32 %v2411_v8, %v1741_v9 }
 0x929   :  { %1745 = vst [vmem:[#allocation7] sm:$0xff] %v1742_v10 }
 0x92a   :  { %1756 = dma.vmem_to_hbm [thread:$0]  %s1752_s30, 128, %s1754_s3, [#allocation4]  }
 0x92e   :  { %v1743_v11 = vpop.f32.mrf.mxu3 }
 0x92f   :  { %2514 = dma.done.wait [#allocation4], 128  }
 0x930   :  { %2515 = vsyncadd [#allocation4], 4294967168 }
 0x931   :  { %1761 = vsyncpa [#allocation3], 1 }
 0x932   :  { %1762 = vsyncpa [#allocation6], 1 }
 0x933   :  { %1763 = vsyncpa [#allocation4], 1 }

</bundles_post_ra>
